<compile_context>
chip_gen: v7x
topology: tpu7x:2x2x1
jax: 0.10.0
libtpu: 0.0.40
codegen_flags: <defaults>
</compile_context>

<pallas_src>
import functools

import jax
import jax.numpy as jnp
import numpy as np
from jax.experimental import pallas as pl
from jax.experimental.pallas import tpu as pltpu


def _ru(n, m):
    return ((n + m - 1) // m) * m


# --------------------------------------------------------------------------- #
# Pallas kernel: full forward pass (embedding + LSTM + attention + fc)
# --------------------------------------------------------------------------- #
def _air_kernel(x_ref, we_ref, be_ref, wih_ref, whh_ref, b_ref,
                q_ref, wh_ref, wfc_ref, bfc_ref,
                out_ref, g_scr, *, Bp, T, Rp):
    # ----- hoisted, time-invariant matmuls (M = T*Bp instead of M = Bp/step) --
    # x_ref is time-major flattened: row t*Bp + b corresponds to (t, b).
    e = jnp.dot(x_ref[...], we_ref[...],
                preferred_element_type=jnp.float32) + be_ref[...]        # (T*Bp, Ep)
    # Keep the big (T*Bp, 4Rp) gate projection in VMEM scratch (bounded live
    # range); per-step reads below are sublane-aligned static slices.
    g_scr[...] = jnp.dot(e, wih_ref[...],
                         preferred_element_type=jnp.float32) + b_ref[...]

    whh = whh_ref[...]                                                   # (Rp, 4Rp)

    # ----- LSTM recurrence (h0 = c0 = 0, as in nn.LSTM default) -------------
    # Static unroll: T is small and fixed; h/c live in vregs, only the tiny
    # h @ whh matmul sits on the serial critical path (skipped at t == 0).
    h = None
    c = None
    hs = []
    for t in range(T):
        g_t = g_scr[t * Bp:(t + 1) * Bp, :]                              # (Bp, 4Rp)
        if t == 0:
            gates = g_t                                                  # h0 == 0
        else:
            gates = g_t + jnp.dot(h, whh, preferred_element_type=jnp.float32)
        # gate lane layout (set up in the wrapper): [ i | f | o | g ],
        # each gate exactly Rp = 128-lane aligned.
        sfo = jax.nn.sigmoid(gates[:, :3 * Rp])
        i_g = sfo[:, 0 * Rp:1 * Rp]
        f_g = sfo[:, 1 * Rp:2 * Rp]
        o_g = sfo[:, 2 * Rp:3 * Rp]
        g_g = jnp.tanh(gates[:, 3 * Rp:])
        c = i_g * g_g if t == 0 else f_g * c + i_g * g_g                 # c0 == 0
        h = o_g * jnp.tanh(c)
        hs.append(h)

    # ----- attention + fc -----------------------------------------------------
    # Lane-oriented epilogue: per-step (Bp, 1) score columns (lane reduce),
    # exact streaming softmax; no (T, B, R) stack, no axis-0 reductions.
    qv = q_ref[...]                                                      # (1, Rp)
    s_cols = [jnp.sum(hh * qv, axis=-1, keepdims=True) for hh in hs]     # T x (Bp,1)
    m = s_cols[0]
    for t in range(1, T):
        m = jnp.maximum(m, s_cols[t])
    e_cols = [jnp.exp(s - m) for s in s_cols]                            # T x (Bp,1)
    denom = e_cols[0]
    for t in range(1, T):
        denom = denom + e_cols[t]
    inv = pl.reciprocal(denom, approx=True)                              # (Bp, 1)
    ctx = e_cols[0] * hs[0]
    for t in range(1, T):
        ctx = ctx + e_cols[t] * hs[t]
    ctx = ctx * inv                                                      # (Bp, Rp)

    att = jnp.dot(ctx, wh_ref[...], preferred_element_type=jnp.float32)  # (Bp, Fp)
    out_ref[...] = (jnp.dot(att, wfc_ref[...],
                            preferred_element_type=jnp.float32)
                    + bfc_ref[...])                                      # (Bp, Cp)


# --------------------------------------------------------------------------- #
# Wrapper (padding / layout prep + pallas_call)
# --------------------------------------------------------------------------- #
def _pad2(a, rows, cols):
    return jnp.pad(a, ((0, rows - a.shape[0]), (0, cols - a.shape[1])))


def _perm_pad_gates_cols(w, R, Rp):
    # PyTorch gate order [i|f|g|o] -> [i|f|o|g]; each gate block padded R -> Rp
    # lanes so every gate slice inside the kernel is 128-lane aligned.
    i, f, g, o = jnp.split(w, 4, axis=-1)

    def pad(a):
        return jnp.pad(a, [(0, 0)] * (a.ndim - 1) + [(0, Rp - R)])

    return jnp.concatenate([pad(i), pad(f), pad(o), pad(g)], axis=-1)


def air_predictor_att_forward(x, p):
    """x: (B, T, input_dim) float32 (batch-first, like the PyTorch module)."""
    B, T, Din = x.shape
    E = p["we"].shape[1]
    R = p["whh"].shape[0]
    F = p["wh"].shape[1]
    C = p["wfc"].shape[1]

    Bp = _ru(max(B, 8), 8)      # f32 sublane alignment
    Dp = _ru(Din, 128)          # lane alignment everywhere
    Ep = _ru(E, 128)
    Rp = _ru(R, 128)
    Fp = _ru(F, 128)
    Cp = _ru(C, 128)

    # Gate permutation + lane padding; fold the two LSTM biases.
    wih = _pad2(_perm_pad_gates_cols(p["wih"], R, Rp), Ep, 4 * Rp)       # (Ep, 4Rp)
    whh = _pad2(_perm_pad_gates_cols(p["whh"], R, Rp), Rp, 4 * Rp)       # (Rp, 4Rp)
    b_lstm = _perm_pad_gates_cols(p["bih"] + p["bhh"], R, Rp)            # (1, 4Rp)

    we = _pad2(p["we"], Dp, Ep)
    be = _pad2(p["be"], 1, Ep)
    q = _pad2(p["q"], 1, Rp)
    wh = _pad2(p["wh"], Rp, Fp)
    wfc = _pad2(p["wfc"], Fp, Cp)
    bfc = _pad2(p["bfc"], 1, Cp)

    # Pad batch + feature, go time-major so step t owns the sublane-aligned,
    # contiguous row block [t*Bp, (t+1)*Bp).  Pad + transpose + reshape fuse
    # into a single XLA copy on the (tiny) input.
    xf = jnp.pad(x.astype(jnp.float32),
                 ((0, Bp - B), (0, 0), (0, Dp - Din)))                   # (Bp, T, Dp)
    x_flat = jnp.transpose(xf, (1, 0, 2)).reshape(T * Bp, Dp)            # (T*Bp, Dp)

    args = (x_flat, we, be, wih, whh, b_lstm, q, wh, wfc, bfc)

    def fullspec(shape):
        nd = len(shape)
        return pl.BlockSpec(shape, lambda i, nd=nd: (0,) * nd)

    kernel = functools.partial(_air_kernel, Bp=Bp, T=T, Rp=Rp)

    out = pl.pallas_call(
        kernel,
        out_shape=jax.ShapeDtypeStruct((Bp, Cp), jnp.float32),
        grid_spec=pltpu.PrefetchScalarGridSpec(
            num_scalar_prefetch=0,
            grid=(1,),
            in_specs=[fullspec(a.shape) for a in args],
            out_specs=fullspec((Bp, Cp)),
            scratch_shapes=[pltpu.VMEM((T * Bp, 4 * Rp), jnp.float32)],
        ),
        compiler_params=pltpu.CompilerParams(
            dimension_semantics=("arbitrary",),
            vmem_limit_bytes=32 * 1024 * 1024,
        ),
    )(*args)
    return out[:B, :C]


# --------------------------------------------------------------------------- #
# Deterministic parameter init (shapes follow the PyTorch __init__)
# --------------------------------------------------------------------------- #
def init_params(key, input_dim, embed_dim, rnn_dim, fc_dim, num_classes):
    ks = jax.random.split(key, 10)
    s = 0.1
    return {
        # nn.Linear(input_dim, embed_dim): weight (E, Din) -> stored (Din, E)
        "we":  s * jax.random.normal(ks[0], (input_dim, embed_dim), jnp.float32),
        "be":  s * jax.random.normal(ks[1], (1, embed_dim), jnp.float32),
        # nn.LSTM: weight_ih (4R, E) -> (E, 4R); weight_hh (4R, R) -> (R, 4R)
        "wih": s * jax.random.normal(ks[2], (embed_dim, 4 * rnn_dim), jnp.float32),
        "whh": s * jax.random.normal(ks[3], (rnn_dim, 4 * rnn_dim), jnp.float32),
        "bih": s * jax.random.normal(ks[4], (1, 4 * rnn_dim), jnp.float32),
        "bhh": s * jax.random.normal(ks[5], (1, 4 * rnn_dim), jnp.float32),
        # attention params
        "q":   s * jax.random.normal(ks[6], (1, rnn_dim), jnp.float32),
        "wh":  s * jax.random.normal(ks[7], (rnn_dim, fc_dim), jnp.float32),
        # nn.Linear(fc_dim, num_classes): weight (C, F) -> stored (F, C)
        "wfc": s * jax.random.normal(ks[8], (fc_dim, num_classes), jnp.float32),
        "bfc": s * jax.random.normal(ks[9], (1, num_classes), jnp.float32),
    }


# --------------------------------------------------------------------------- #
# Pure-JAX reference (mirrors the PyTorch forward exactly)
# --------------------------------------------------------------------------- #
def reference_forward(x, p):
    B, T, _ = x.shape
    R = p["whh"].shape[0]
    emb = x @ p["we"] + p["be"][0]                            # (B, T, E)
    h = jnp.zeros((B, R), jnp.float32)
    c = jnp.zeros((B, R), jnp.float32)
    hs = []
    for t in range(T):
        g = emb[:, t, :] @ p["wih"] + h @ p["whh"] + p["bih"][0] + p["bhh"][0]
        i = jax.nn.sigmoid(g[:, 0 * R:1 * R])
        f = jax.nn.sigmoid(g[:, 1 * R:2 * R])
        gg = jnp.tanh(g[:, 2 * R:3 * R])
        o = jax.nn.sigmoid(g[:, 3 * R:4 * R])
        c = f * c + i * gg
        h = o * jnp.tanh(c)
        hs.append(h)
    H = jnp.stack(hs, axis=1)                                 # (B, T, R)
    scores = jnp.einsum("btr,r->bt", H, p["q"][0])
    w = jax.nn.softmax(scores, axis=-1)
    ctx = jnp.einsum("bt,btr->br", w, H)
    att = ctx @ p["wh"]
    return att @ p["wfc"] + p["bfc"][0]


# --------------------------------------------------------------------------- #
if __name__ == "__main__":
    B, T = 2, 8
    input_dim, embed_dim, rnn_dim, fc_dim, num_classes = 16, 32, 32, 32, 8

    key = jax.random.PRNGKey(0)
    kx, kp = jax.random.split(key)
    x = jax.random.normal(kx, (B, T, input_dim), jnp.float32)
    params = init_params(kp, input_dim, embed_dim, rnn_dim, fc_dim, num_classes)

    out = jax.jit(air_predictor_att_forward)(x, params)
    out = jax.block_until_ready(out)

    ref = reference_forward(x, params)
    assert out.shape == (B, num_classes)
    if not np.allclose(np.asarray(out), np.asarray(ref), atol=1e-3, rtol=1e-3):
        raise AssertionError(
            f"kernel/reference mismatch, max abs diff = "
            f"{np.max(np.abs(np.asarray(out) - np.asarray(ref)))}"
        )
    print("KERNEL_OK")
</pallas_src>

<mosaic_0001>
module attributes {stable_mosaic.version = 11 : i64} {
  func.func @_air_kernel(%arg0: i32, %arg1: memref<64x128xf32, #tpu.memory_space<vmem>>, %arg2: memref<128x128xf32, #tpu.memory_space<vmem>>, %arg3: memref<1x128xf32, #tpu.memory_space<vmem>>, %arg4: memref<128x512xf32, #tpu.memory_space<vmem>>, %arg5: memref<128x512xf32, #tpu.memory_space<vmem>>, %arg6: memref<1x512xf32, #tpu.memory_space<vmem>>, %arg7: memref<1x128xf32, #tpu.memory_space<vmem>>, %arg8: memref<128x128xf32, #tpu.memory_space<vmem>>, %arg9: memref<128x128xf32, #tpu.memory_space<vmem>>, %arg10: memref<1x128xf32, #tpu.memory_space<vmem>>, %arg11: memref<8x128xf32, #tpu.memory_space<vmem>>, %arg12: memref<64x512xf32, #tpu.memory_space<vmem>>) attributes {dimension_semantics = [#tpu.dimension_semantics<arbitrary>], iteration_bounds = array<i64: 1>, scalar_prefetch = 0 : i64, scratch_operands = 1 : i64, tpu.core_type = #tpu.core_type<tc>, window_params = [{pipeline_mode = #tpu.pipeline_mode<synchronous>, transform_indices = @transform_0, window_bounds = array<i64: 64, 128>}, {pipeline_mode = #tpu.pipeline_mode<synchronous>, transform_indices = @transform_1, window_bounds = array<i64: 128, 128>}, {pipeline_mode = #tpu.pipeline_mode<synchronous>, transform_indices = @transform_2, window_bounds = array<i64: 1, 128>}, {pipeline_mode = #tpu.pipeline_mode<synchronous>, transform_indices = @transform_3, window_bounds = array<i64: 128, 512>}, {pipeline_mode = #tpu.pipeline_mode<synchronous>, transform_indices = @transform_4, window_bounds = array<i64: 128, 512>}, {pipeline_mode = #tpu.pipeline_mode<synchronous>, transform_indices = @transform_5, window_bounds = array<i64: 1, 512>}, {pipeline_mode = #tpu.pipeline_mode<synchronous>, transform_indices = @transform_6, window_bounds = array<i64: 1, 128>}, {pipeline_mode = #tpu.pipeline_mode<synchronous>, transform_indices = @transform_7, window_bounds = array<i64: 128, 128>}, {pipeline_mode = #tpu.pipeline_mode<synchronous>, transform_indices = @transform_8, window_bounds = array<i64: 128, 128>}, {pipeline_mode = #tpu.pipeline_mode<synchronous>, transform_indices = @transform_9, window_bounds = array<i64: 1, 128>}, {pipeline_mode = #tpu.pipeline_mode<synchronous>, transform_indices = @transform_10, window_bounds = array<i64: 8, 128>}]} {
    %c0 = arith.constant 0 : index
    %c0_0 = arith.constant 0 : index
    %0 = vector.load %arg1[%c0, %c0_0] : memref<64x128xf32, #tpu.memory_space<vmem>>, vector<64x128xf32>
    %c0_1 = arith.constant 0 : index
    %c0_2 = arith.constant 0 : index
    %1 = vector.load %arg2[%c0_1, %c0_2] : memref<128x128xf32, #tpu.memory_space<vmem>>, vector<128x128xf32>
    %cst = arith.constant dense<0.000000e+00> : vector<64x128xf32>
    %2 = tpu.matmul %0, %1, %cst {dimension_numbers = #tpu.dot_dimension_numbers<[1], [0], [0], [1], [0, 0, 1, 1], [], []>} : vector<64x128xf32>, vector<128x128xf32>, vector<64x128xf32> -> vector<64x128xf32>
    %c0_3 = arith.constant 0 : index
    %c0_4 = arith.constant 0 : index
    %3 = vector.load %arg3[%c0_3, %c0_4] : memref<1x128xf32, #tpu.memory_space<vmem>>, vector<1x128xf32>
    %4 = vector.broadcast %3 : vector<1x128xf32> to vector<64x128xf32>
    %5 = arith.addf %2, %4 : vector<64x128xf32>
    %c0_5 = arith.constant 0 : index
    %c0_6 = arith.constant 0 : index
    %6 = vector.load %arg4[%c0_5, %c0_6] : memref<128x512xf32, #tpu.memory_space<vmem>>, vector<128x512xf32>
    %cst_7 = arith.constant dense<0.000000e+00> : vector<64x512xf32>
    %7 = tpu.matmul %5, %6, %cst_7 {dimension_numbers = #tpu.dot_dimension_numbers<[1], [0], [0], [1], [0, 0, 1, 1], [], []>} : vector<64x128xf32>, vector<128x512xf32>, vector<64x512xf32> -> vector<64x512xf32>
    %c0_8 = arith.constant 0 : index
    %c0_9 = arith.constant 0 : index
    %8 = vector.load %arg6[%c0_8, %c0_9] : memref<1x512xf32, #tpu.memory_space<vmem>>, vector<1x512xf32>
    %9 = vector.broadcast %8 : vector<1x512xf32> to vector<64x512xf32>
    %10 = arith.addf %7, %9 : vector<64x512xf32>
    %c0_10 = arith.constant 0 : index
    %c0_11 = arith.constant 0 : index
    %11 = vector.load %arg12[%c0_10, %c0_11] : memref<64x512xf32, #tpu.memory_space<vmem>>, vector<64x512xf32>
    tpu.vector_store %arg12[%c0_10, %c0_11], %10 {strides = array<i32>} : memref<64x512xf32, #tpu.memory_space<vmem>>, vector<64x512xf32>,
    %c0_12 = arith.constant 0 : index
    %c0_13 = arith.constant 0 : index
    %12 = vector.load %arg5[%c0_12, %c0_13] : memref<128x512xf32, #tpu.memory_space<vmem>>, vector<128x512xf32>
    %c0_14 = arith.constant 0 : index
    %c0_15 = arith.constant 0 : index
    %13 = vector.load %arg12[%c0_14, %c0_15] : memref<64x512xf32, #tpu.memory_space<vmem>>, vector<8x512xf32>
    %14 = vector.extract_strided_slice %13 {offsets = [0, 0], sizes = [8, 384], strides = [1, 1]} : vector<8x512xf32> to vector<8x384xf32>
    %15 = arith.negf %14 : vector<8x384xf32>
    %16 = math.exp %15 : vector<8x384xf32>
    %cst_16 = arith.constant 1.000000e+00 : f32
    %17 = vector.broadcast %cst_16 : f32 to vector<8x384xf32>
    %18 = arith.addf %17, %16 : vector<8x384xf32>
    %19 = arith.divf %17, %18 : vector<8x384xf32>
    %20 = vector.extract_strided_slice %19 {offsets = [0, 0], sizes = [8, 128], strides = [1, 1]} : vector<8x384xf32> to vector<8x128xf32>
    %21 = vector.extract_strided_slice %19 {offsets = [0, 256], sizes = [8, 128], strides = [1, 1]} : vector<8x384xf32> to vector<8x128xf32>
    %22 = vector.extract_strided_slice %13 {offsets = [0, 384], sizes = [8, 128], strides = [1, 1]} : vector<8x512xf32> to vector<8x128xf32>
    %23 = math.tanh %22 : vector<8x128xf32>
    %24 = arith.mulf %20, %23 : vector<8x128xf32>
    %25 = math.tanh %24 : vector<8x128xf32>
    %26 = arith.mulf %21, %25 : vector<8x128xf32>
    %c8 = arith.constant 8 : index
    %c0_17 = arith.constant 0 : index
    %27 = vector.load %arg12[%c8, %c0_17] : memref<64x512xf32, #tpu.memory_space<vmem>>, vector<8x512xf32>
    %cst_18 = arith.constant dense<0.000000e+00> : vector<8x512xf32>
    %28 = tpu.matmul %26, %12, %cst_18 {dimension_numbers = #tpu.dot_dimension_numbers<[1], [0], [0], [1], [0, 0, 1, 1], [], []>} : vector<8x128xf32>, vector<128x512xf32>, vector<8x512xf32> -> vector<8x512xf32>
    %29 = arith.addf %27, %28 : vector<8x512xf32>
    %30 = vector.extract_strided_slice %29 {offsets = [0, 0], sizes = [8, 384], strides = [1, 1]} : vector<8x512xf32> to vector<8x384xf32>
    %31 = arith.negf %30 : vector<8x384xf32>
    %32 = math.exp %31 : vector<8x384xf32>
    %cst_19 = arith.constant 1.000000e+00 : f32
    %33 = vector.broadcast %cst_19 : f32 to vector<8x384xf32>
    %34 = arith.addf %33, %32 : vector<8x384xf32>
    %35 = arith.divf %33, %34 : vector<8x384xf32>
    %36 = vector.extract_strided_slice %35 {offsets = [0, 0], sizes = [8, 128], strides = [1, 1]} : vector<8x384xf32> to vector<8x128xf32>
    %37 = vector.extract_strided_slice %35 {offsets = [0, 128], sizes = [8, 128], strides = [1, 1]} : vector<8x384xf32> to vector<8x128xf32>
    %38 = vector.extract_strided_slice %35 {offsets = [0, 256], sizes = [8, 128], strides = [1, 1]} : vector<8x384xf32> to vector<8x128xf32>
    %39 = vector.extract_strided_slice %29 {offsets = [0, 384], sizes = [8, 128], strides = [1, 1]} : vector<8x512xf32> to vector<8x128xf32>
    %40 = math.tanh %39 : vector<8x128xf32>
    %41 = arith.mulf %37, %24 : vector<8x128xf32>
    %42 = arith.mulf %36, %40 : vector<8x128xf32>
    %43 = arith.addf %41, %42 : vector<8x128xf32>
    %44 = math.tanh %43 : vector<8x128xf32>
    %45 = arith.mulf %38, %44 : vector<8x128xf32>
    %c16 = arith.constant 16 : index
    %c0_20 = arith.constant 0 : index
    %46 = vector.load %arg12[%c16, %c0_20] : memref<64x512xf32, #tpu.memory_space<vmem>>, vector<8x512xf32>
    %cst_21 = arith.constant dense<0.000000e+00> : vector<8x512xf32>
    %47 = tpu.matmul %45, %12, %cst_21 {dimension_numbers = #tpu.dot_dimension_numbers<[1], [0], [0], [1], [0, 0, 1, 1], [], []>} : vector<8x128xf32>, vector<128x512xf32>, vector<8x512xf32> -> vector<8x512xf32>
    %48 = arith.addf %46, %47 : vector<8x512xf32>
    %49 = vector.extract_strided_slice %48 {offsets = [0, 0], sizes = [8, 384], strides = [1, 1]} : vector<8x512xf32> to vector<8x384xf32>
    %50 = arith.negf %49 : vector<8x384xf32>
    %51 = math.exp %50 : vector<8x384xf32>
    %cst_22 = arith.constant 1.000000e+00 : f32
    %52 = vector.broadcast %cst_22 : f32 to vector<8x384xf32>
    %53 = arith.addf %52, %51 : vector<8x384xf32>
    %54 = arith.divf %52, %53 : vector<8x384xf32>
    %55 = vector.extract_strided_slice %54 {offsets = [0, 0], sizes = [8, 128], strides = [1, 1]} : vector<8x384xf32> to vector<8x128xf32>
    %56 = vector.extract_strided_slice %54 {offsets = [0, 128], sizes = [8, 128], strides = [1, 1]} : vector<8x384xf32> to vector<8x128xf32>
    %57 = vector.extract_strided_slice %54 {offsets = [0, 256], sizes = [8, 128], strides = [1, 1]} : vector<8x384xf32> to vector<8x128xf32>
    %58 = vector.extract_strided_slice %48 {offsets = [0, 384], sizes = [8, 128], strides = [1, 1]} : vector<8x512xf32> to vector<8x128xf32>
    %59 = math.tanh %58 : vector<8x128xf32>
    %60 = arith.mulf %56, %43 : vector<8x128xf32>
    %61 = arith.mulf %55, %59 : vector<8x128xf32>
    %62 = arith.addf %60, %61 : vector<8x128xf32>
    %63 = math.tanh %62 : vector<8x128xf32>
    %64 = arith.mulf %57, %63 : vector<8x128xf32>
    %c24 = arith.constant 24 : index
    %c0_23 = arith.constant 0 : index
    %65 = vector.load %arg12[%c24, %c0_23] : memref<64x512xf32, #tpu.memory_space<vmem>>, vector<8x512xf32>
    %cst_24 = arith.constant dense<0.000000e+00> : vector<8x512xf32>
    %66 = tpu.matmul %64, %12, %cst_24 {dimension_numbers = #tpu.dot_dimension_numbers<[1], [0], [0], [1], [0, 0, 1, 1], [], []>} : vector<8x128xf32>, vector<128x512xf32>, vector<8x512xf32> -> vector<8x512xf32>
    %67 = arith.addf %65, %66 : vector<8x512xf32>
    %68 = vector.extract_strided_slice %67 {offsets = [0, 0], sizes = [8, 384], strides = [1, 1]} : vector<8x512xf32> to vector<8x384xf32>
    %69 = arith.negf %68 : vector<8x384xf32>
    %70 = math.exp %69 : vector<8x384xf32>
    %cst_25 = arith.constant 1.000000e+00 : f32
    %71 = vector.broadcast %cst_25 : f32 to vector<8x384xf32>
    %72 = arith.addf %71, %70 : vector<8x384xf32>
    %73 = arith.divf %71, %72 : vector<8x384xf32>
    %74 = vector.extract_strided_slice %73 {offsets = [0, 0], sizes = [8, 128], strides = [1, 1]} : vector<8x384xf32> to vector<8x128xf32>
    %75 = vector.extract_strided_slice %73 {offsets = [0, 128], sizes = [8, 128], strides = [1, 1]} : vector<8x384xf32> to vector<8x128xf32>
    %76 = vector.extract_strided_slice %73 {offsets = [0, 256], sizes = [8, 128], strides = [1, 1]} : vector<8x384xf32> to vector<8x128xf32>
    %77 = vector.extract_strided_slice %67 {offsets = [0, 384], sizes = [8, 128], strides = [1, 1]} : vector<8x512xf32> to vector<8x128xf32>
    %78 = math.tanh %77 : vector<8x128xf32>
    %79 = arith.mulf %75, %62 : vector<8x128xf32>
    %80 = arith.mulf %74, %78 : vector<8x128xf32>
    %81 = arith.addf %79, %80 : vector<8x128xf32>
    %82 = math.tanh %81 : vector<8x128xf32>
    %83 = arith.mulf %76, %82 : vector<8x128xf32>
    %c32 = arith.constant 32 : index
    %c0_26 = arith.constant 0 : index
    %84 = vector.load %arg12[%c32, %c0_26] : memref<64x512xf32, #tpu.memory_space<vmem>>, vector<8x512xf32>
    %cst_27 = arith.constant dense<0.000000e+00> : vector<8x512xf32>
    %85 = tpu.matmul %83, %12, %cst_27 {dimension_numbers = #tpu.dot_dimension_numbers<[1], [0], [0], [1], [0, 0, 1, 1], [], []>} : vector<8x128xf32>, vector<128x512xf32>, vector<8x512xf32> -> vector<8x512xf32>
    %86 = arith.addf %84, %85 : vector<8x512xf32>
    %87 = vector.extract_strided_slice %86 {offsets = [0, 0], sizes = [8, 384], strides = [1, 1]} : vector<8x512xf32> to vector<8x384xf32>
    %88 = arith.negf %87 : vector<8x384xf32>
    %89 = math.exp %88 : vector<8x384xf32>
    %cst_28 = arith.constant 1.000000e+00 : f32
    %90 = vector.broadcast %cst_28 : f32 to vector<8x384xf32>
    %91 = arith.addf %90, %89 : vector<8x384xf32>
    %92 = arith.divf %90, %91 : vector<8x384xf32>
    %93 = vector.extract_strided_slice %92 {offsets = [0, 0], sizes = [8, 128], strides = [1, 1]} : vector<8x384xf32> to vector<8x128xf32>
    %94 = vector.extract_strided_slice %92 {offsets = [0, 128], sizes = [8, 128], strides = [1, 1]} : vector<8x384xf32> to vector<8x128xf32>
    %95 = vector.extract_strided_slice %92 {offsets = [0, 256], sizes = [8, 128], strides = [1, 1]} : vector<8x384xf32> to vector<8x128xf32>
    %96 = vector.extract_strided_slice %86 {offsets = [0, 384], sizes = [8, 128], strides = [1, 1]} : vector<8x512xf32> to vector<8x128xf32>
    %97 = math.tanh %96 : vector<8x128xf32>
    %98 = arith.mulf %94, %81 : vector<8x128xf32>
    %99 = arith.mulf %93, %97 : vector<8x128xf32>
    %100 = arith.addf %98, %99 : vector<8x128xf32>
    %101 = math.tanh %100 : vector<8x128xf32>
    %102 = arith.mulf %95, %101 : vector<8x128xf32>
    %c40 = arith.constant 40 : index
    %c0_29 = arith.constant 0 : index
    %103 = vector.load %arg12[%c40, %c0_29] : memref<64x512xf32, #tpu.memory_space<vmem>>, vector<8x512xf32>
    %cst_30 = arith.constant dense<0.000000e+00> : vector<8x512xf32>
    %104 = tpu.matmul %102, %12, %cst_30 {dimension_numbers = #tpu.dot_dimension_numbers<[1], [0], [0], [1], [0, 0, 1, 1], [], []>} : vector<8x128xf32>, vector<128x512xf32>, vector<8x512xf32> -> vector<8x512xf32>
    %105 = arith.addf %103, %104 : vector<8x512xf32>
    %106 = vector.extract_strided_slice %105 {offsets = [0, 0], sizes = [8, 384], strides = [1, 1]} : vector<8x512xf32> to vector<8x384xf32>
    %107 = arith.negf %106 : vector<8x384xf32>
    %108 = math.exp %107 : vector<8x384xf32>
    %cst_31 = arith.constant 1.000000e+00 : f32
    %109 = vector.broadcast %cst_31 : f32 to vector<8x384xf32>
    %110 = arith.addf %109, %108 : vector<8x384xf32>
    %111 = arith.divf %109, %110 : vector<8x384xf32>
    %112 = vector.extract_strided_slice %111 {offsets = [0, 0], sizes = [8, 128], strides = [1, 1]} : vector<8x384xf32> to vector<8x128xf32>
    %113 = vector.extract_strided_slice %111 {offsets = [0, 128], sizes = [8, 128], strides = [1, 1]} : vector<8x384xf32> to vector<8x128xf32>
    %114 = vector.extract_strided_slice %111 {offsets = [0, 256], sizes = [8, 128], strides = [1, 1]} : vector<8x384xf32> to vector<8x128xf32>
    %115 = vector.extract_strided_slice %105 {offsets = [0, 384], sizes = [8, 128], strides = [1, 1]} : vector<8x512xf32> to vector<8x128xf32>
    %116 = math.tanh %115 : vector<8x128xf32>
    %117 = arith.mulf %113, %100 : vector<8x128xf32>
    %118 = arith.mulf %112, %116 : vector<8x128xf32>
    %119 = arith.addf %117, %118 : vector<8x128xf32>
    %120 = math.tanh %119 : vector<8x128xf32>
    %121 = arith.mulf %114, %120 : vector<8x128xf32>
    %c48 = arith.constant 48 : index
    %c0_32 = arith.constant 0 : index
    %122 = vector.load %arg12[%c48, %c0_32] : memref<64x512xf32, #tpu.memory_space<vmem>>, vector<8x512xf32>
    %cst_33 = arith.constant dense<0.000000e+00> : vector<8x512xf32>
    %123 = tpu.matmul %121, %12, %cst_33 {dimension_numbers = #tpu.dot_dimension_numbers<[1], [0], [0], [1], [0, 0, 1, 1], [], []>} : vector<8x128xf32>, vector<128x512xf32>, vector<8x512xf32> -> vector<8x512xf32>
    %124 = arith.addf %122, %123 : vector<8x512xf32>
    %125 = vector.extract_strided_slice %124 {offsets = [0, 0], sizes = [8, 384], strides = [1, 1]} : vector<8x512xf32> to vector<8x384xf32>
    %126 = arith.negf %125 : vector<8x384xf32>
    %127 = math.exp %126 : vector<8x384xf32>
    %cst_34 = arith.constant 1.000000e+00 : f32
    %128 = vector.broadcast %cst_34 : f32 to vector<8x384xf32>
    %129 = arith.addf %128, %127 : vector<8x384xf32>
    %130 = arith.divf %128, %129 : vector<8x384xf32>
    %131 = vector.extract_strided_slice %130 {offsets = [0, 0], sizes = [8, 128], strides = [1, 1]} : vector<8x384xf32> to vector<8x128xf32>
    %132 = vector.extract_strided_slice %130 {offsets = [0, 128], sizes = [8, 128], strides = [1, 1]} : vector<8x384xf32> to vector<8x128xf32>
    %133 = vector.extract_strided_slice %130 {offsets = [0, 256], sizes = [8, 128], strides = [1, 1]} : vector<8x384xf32> to vector<8x128xf32>
    %134 = vector.extract_strided_slice %124 {offsets = [0, 384], sizes = [8, 128], strides = [1, 1]} : vector<8x512xf32> to vector<8x128xf32>
    %135 = math.tanh %134 : vector<8x128xf32>
    %136 = arith.mulf %132, %119 : vector<8x128xf32>
    %137 = arith.mulf %131, %135 : vector<8x128xf32>
    %138 = arith.addf %136, %137 : vector<8x128xf32>
    %139 = math.tanh %138 : vector<8x128xf32>
    %140 = arith.mulf %133, %139 : vector<8x128xf32>
    %c56 = arith.constant 56 : index
    %c0_35 = arith.constant 0 : index
    %141 = vector.load %arg12[%c56, %c0_35] : memref<64x512xf32, #tpu.memory_space<vmem>>, vector<8x512xf32>
    %cst_36 = arith.constant dense<0.000000e+00> : vector<8x512xf32>
    %142 = tpu.matmul %140, %12, %cst_36 {dimension_numbers = #tpu.dot_dimension_numbers<[1], [0], [0], [1], [0, 0, 1, 1], [], []>} : vector<8x128xf32>, vector<128x512xf32>, vector<8x512xf32> -> vector<8x512xf32>
    %143 = arith.addf %141, %142 : vector<8x512xf32>
    %144 = vector.extract_strided_slice %143 {offsets = [0, 0], sizes = [8, 384], strides = [1, 1]} : vector<8x512xf32> to vector<8x384xf32>
    %145 = arith.negf %144 : vector<8x384xf32>
    %146 = math.exp %145 : vector<8x384xf32>
    %cst_37 = arith.constant 1.000000e+00 : f32
    %147 = vector.broadcast %cst_37 : f32 to vector<8x384xf32>
    %148 = arith.addf %147, %146 : vector<8x384xf32>
    %149 = arith.divf %147, %148 : vector<8x384xf32>
    %150 = vector.extract_strided_slice %149 {offsets = [0, 0], sizes = [8, 128], strides = [1, 1]} : vector<8x384xf32> to vector<8x128xf32>
    %151 = vector.extract_strided_slice %149 {offsets = [0, 128], sizes = [8, 128], strides = [1, 1]} : vector<8x384xf32> to vector<8x128xf32>
    %152 = vector.extract_strided_slice %149 {offsets = [0, 256], sizes = [8, 128], strides = [1, 1]} : vector<8x384xf32> to vector<8x128xf32>
    %153 = vector.extract_strided_slice %143 {offsets = [0, 384], sizes = [8, 128], strides = [1, 1]} : vector<8x512xf32> to vector<8x128xf32>
    %154 = math.tanh %153 : vector<8x128xf32>
    %155 = arith.mulf %151, %138 : vector<8x128xf32>
    %156 = arith.mulf %150, %154 : vector<8x128xf32>
    %157 = arith.addf %155, %156 : vector<8x128xf32>
    %158 = math.tanh %157 : vector<8x128xf32>
    %159 = arith.mulf %152, %158 : vector<8x128xf32>
    %c0_38 = arith.constant 0 : index
    %c0_39 = arith.constant 0 : index
    %160 = vector.load %arg7[%c0_38, %c0_39] : memref<1x128xf32, #tpu.memory_space<vmem>>, vector<1x128xf32>
    %161 = vector.broadcast %160 : vector<1x128xf32> to vector<8x128xf32>
    %162 = arith.mulf %26, %161 : vector<8x128xf32>
    %cst_40 = arith.constant dense<0.000000e+00> : vector<8xf32>
    %163 = vector.multi_reduction <add>, %162, %cst_40 [1] : vector<8x128xf32> to vector<8xf32>
    %164 = vector.shape_cast %163 : vector<8xf32> to vector<8x1xf32>
    %165 = vector.broadcast %160 : vector<1x128xf32> to vector<8x128xf32>
    %166 = arith.mulf %45, %165 : vector<8x128xf32>
    %cst_41 = arith.constant dense<0.000000e+00> : vector<8xf32>
    %167 = vector.multi_reduction <add>, %166, %cst_41 [1] : vector<8x128xf32> to vector<8xf32>
    %168 = vector.shape_cast %167 : vector<8xf32> to vector<8x1xf32>
    %169 = vector.broadcast %160 : vector<1x128xf32> to vector<8x128xf32>
    %170 = arith.mulf %64, %169 : vector<8x128xf32>
    %cst_42 = arith.constant dense<0.000000e+00> : vector<8xf32>
    %171 = vector.multi_reduction <add>, %170, %cst_42 [1] : vector<8x128xf32> to vector<8xf32>
    %172 = vector.shape_cast %171 : vector<8xf32> to vector<8x1xf32>
    %173 = vector.broadcast %160 : vector<1x128xf32> to vector<8x128xf32>
    %174 = arith.mulf %83, %173 : vector<8x128xf32>
    %cst_43 = arith.constant dense<0.000000e+00> : vector<8xf32>
    %175 = vector.multi_reduction <add>, %174, %cst_43 [1] : vector<8x128xf32> to vector<8xf32>
    %176 = vector.shape_cast %175 : vector<8xf32> to vector<8x1xf32>
    %177 = vector.broadcast %160 : vector<1x128xf32> to vector<8x128xf32>
    %178 = arith.mulf %102, %177 : vector<8x128xf32>
    %cst_44 = arith.constant dense<0.000000e+00> : vector<8xf32>
    %179 = vector.multi_reduction <add>, %178, %cst_44 [1] : vector<8x128xf32> to vector<8xf32>
    %180 = vector.shape_cast %179 : vector<8xf32> to vector<8x1xf32>
    %181 = vector.broadcast %160 : vector<1x128xf32> to vector<8x128xf32>
    %182 = arith.mulf %121, %181 : vector<8x128xf32>
    %cst_45 = arith.constant dense<0.000000e+00> : vector<8xf32>
    %183 = vector.multi_reduction <add>, %182, %cst_45 [1] : vector<8x128xf32> to vector<8xf32>
    %184 = vector.shape_cast %183 : vector<8xf32> to vector<8x1xf32>
    %185 = vector.broadcast %160 : vector<1x128xf32> to vector<8x128xf32>
    %186 = arith.mulf %140, %185 : vector<8x128xf32>
    %cst_46 = arith.constant dense<0.000000e+00> : vector<8xf32>
    %187 = vector.multi_reduction <add>, %186, %cst_46 [1] : vector<8x128xf32> to vector<8xf32>
    %188 = vector.shape_cast %187 : vector<8xf32> to vector<8x1xf32>
    %189 = vector.broadcast %160 : vector<1x128xf32> to vector<8x128xf32>
    %190 = arith.mulf %159, %189 : vector<8x128xf32>
    %cst_47 = arith.constant dense<0.000000e+00> : vector<8xf32>
    %191 = vector.multi_reduction <add>, %190, %cst_47 [1] : vector<8x128xf32> to vector<8xf32>
    %192 = vector.shape_cast %191 : vector<8xf32> to vector<8x1xf32>
    %193 = arith.maximumf %164, %168 : vector<8x1xf32>
    %194 = arith.maximumf %193, %172 : vector<8x1xf32>
    %195 = arith.maximumf %194, %176 : vector<8x1xf32>
    %196 = arith.maximumf %195, %180 : vector<8x1xf32>
    %197 = arith.maximumf %196, %184 : vector<8x1xf32>
    %198 = arith.maximumf %197, %188 : vector<8x1xf32>
    %199 = arith.maximumf %198, %192 : vector<8x1xf32>
    %200 = arith.subf %164, %199 : vector<8x1xf32>
    %201 = math.exp %200 : vector<8x1xf32>
    %202 = arith.subf %168, %199 : vector<8x1xf32>
    %203 = math.exp %202 : vector<8x1xf32>
    %204 = arith.subf %172, %199 : vector<8x1xf32>
    %205 = math.exp %204 : vector<8x1xf32>
    %206 = arith.subf %176, %199 : vector<8x1xf32>
    %207 = math.exp %206 : vector<8x1xf32>
    %208 = arith.subf %180, %199 : vector<8x1xf32>
    %209 = math.exp %208 : vector<8x1xf32>
    %210 = arith.subf %184, %199 : vector<8x1xf32>
    %211 = math.exp %210 : vector<8x1xf32>
    %212 = arith.subf %188, %199 : vector<8x1xf32>
    %213 = math.exp %212 : vector<8x1xf32>
    %214 = arith.subf %192, %199 : vector<8x1xf32>
    %215 = math.exp %214 : vector<8x1xf32>
    %216 = arith.addf %201, %203 : vector<8x1xf32>
    %217 = arith.addf %216, %205 : vector<8x1xf32>
    %218 = arith.addf %217, %207 : vector<8x1xf32>
    %219 = arith.addf %218, %209 : vector<8x1xf32>
    %220 = arith.addf %219, %211 : vector<8x1xf32>
    %221 = arith.addf %220, %213 : vector<8x1xf32>
    %222 = arith.addf %221, %215 : vector<8x1xf32>
    %223 = tpu.reciprocal %222 {approx = true} : vector<8x1xf32> -> vector<8x1xf32>
    %224 = vector.broadcast %201 : vector<8x1xf32> to vector<8x128xf32>
    %225 = arith.mulf %224, %26 : vector<8x128xf32>
    %226 = vector.broadcast %203 : vector<8x1xf32> to vector<8x128xf32>
    %227 = arith.mulf %226, %45 : vector<8x128xf32>
    %228 = arith.addf %225, %227 : vector<8x128xf32>
    %229 = vector.broadcast %205 : vector<8x1xf32> to vector<8x128xf32>
    %230 = arith.mulf %229, %64 : vector<8x128xf32>
    %231 = arith.addf %228, %230 : vector<8x128xf32>
    %232 = vector.broadcast %207 : vector<8x1xf32> to vector<8x128xf32>
    %233 = arith.mulf %232, %83 : vector<8x128xf32>
    %234 = arith.addf %231, %233 : vector<8x128xf32>
    %235 = vector.broadcast %209 : vector<8x1xf32> to vector<8x128xf32>
    %236 = arith.mulf %235, %102 : vector<8x128xf32>
    %237 = arith.addf %234, %236 : vector<8x128xf32>
    %238 = vector.broadcast %211 : vector<8x1xf32> to vector<8x128xf32>
    %239 = arith.mulf %238, %121 : vector<8x128xf32>
    %240 = arith.addf %237, %239 : vector<8x128xf32>
    %241 = vector.broadcast %213 : vector<8x1xf32> to vector<8x128xf32>
    %242 = arith.mulf %241, %140 : vector<8x128xf32>
    %243 = arith.addf %240, %242 : vector<8x128xf32>
    %244 = vector.broadcast %215 : vector<8x1xf32> to vector<8x128xf32>
    %245 = arith.mulf %244, %159 : vector<8x128xf32>
    %246 = arith.addf %243, %245 : vector<8x128xf32>
    %247 = vector.broadcast %223 : vector<8x1xf32> to vector<8x128xf32>
    %248 = arith.mulf %246, %247 : vector<8x128xf32>
    %c0_48 = arith.constant 0 : index
    %c0_49 = arith.constant 0 : index
    %249 = vector.load %arg8[%c0_48, %c0_49] : memref<128x128xf32, #tpu.memory_space<vmem>>, vector<128x128xf32>
    %cst_50 = arith.constant dense<0.000000e+00> : vector<8x128xf32>
    %250 = tpu.matmul %248, %249, %cst_50 {dimension_numbers = #tpu.dot_dimension_numbers<[1], [0], [0], [1], [0, 0, 1, 1], [], []>} : vector<8x128xf32>, vector<128x128xf32>, vector<8x128xf32> -> vector<8x128xf32>
    %c0_51 = arith.constant 0 : index
    %c0_52 = arith.constant 0 : index
    %251 = vector.load %arg9[%c0_51, %c0_52] : memref<128x128xf32, #tpu.memory_space<vmem>>, vector<128x128xf32>
    %cst_53 = arith.constant dense<0.000000e+00> : vector<8x128xf32>
    %252 = tpu.matmul %250, %251, %cst_53 {dimension_numbers = #tpu.dot_dimension_numbers<[1], [0], [0], [1], [0, 0, 1, 1], [], []>} : vector<8x128xf32>, vector<128x128xf32>, vector<8x128xf32> -> vector<8x128xf32>
    %c0_54 = arith.constant 0 : index
    %c0_55 = arith.constant 0 : index
    %253 = vector.load %arg10[%c0_54, %c0_55] : memref<1x128xf32, #tpu.memory_space<vmem>>, vector<1x128xf32>
    %254 = vector.broadcast %253 : vector<1x128xf32> to vector<8x128xf32>
    %255 = arith.addf %252, %254 : vector<8x128xf32>
    %c0_56 = arith.constant 0 : index
    %c0_57 = arith.constant 0 : index
    %256 = vector.load %arg11[%c0_56, %c0_57] : memref<8x128xf32, #tpu.memory_space<vmem>>, vector<8x128xf32>
    tpu.vector_store %arg11[%c0_56, %c0_57], %255 {strides = array<i32>} : memref<8x128xf32, #tpu.memory_space<vmem>>, vector<8x128xf32>,
    return
  }
  func.func @transform_0(%arg0: i32) -> (i32, i32) {
    %c0_i32 = arith.constant 0 : i32
    %c0_i32_0 = arith.constant 0 : i32
    %c0_i32_1 = arith.constant 0 : i32
    return %c0_i32, %c0_i32_0 : i32, i32
  }
  func.func @transform_1(%arg0: i32) -> (i32, i32) {
    %c0_i32 = arith.constant 0 : i32
    %c0_i32_0 = arith.constant 0 : i32
    %c0_i32_1 = arith.constant 0 : i32
    return %c0_i32, %c0_i32_0 : i32, i32
  }
  func.func @transform_2(%arg0: i32) -> (i32, i32) {
    %c0_i32 = arith.constant 0 : i32
    %c0_i32_0 = arith.constant 0 : i32
    %c0_i32_1 = arith.constant 0 : i32
    return %c0_i32, %c0_i32_0 : i32, i32
  }
  func.func @transform_3(%arg0: i32) -> (i32, i32) {
    %c0_i32 = arith.constant 0 : i32
    %c0_i32_0 = arith.constant 0 : i32
    %c0_i32_1 = arith.constant 0 : i32
    return %c0_i32, %c0_i32_0 : i32, i32
  }
  func.func @transform_4(%arg0: i32) -> (i32, i32) {
    %c0_i32 = arith.constant 0 : i32
    %c0_i32_0 = arith.constant 0 : i32
    %c0_i32_1 = arith.constant 0 : i32
    return %c0_i32, %c0_i32_0 : i32, i32
  }
  func.func @transform_5(%arg0: i32) -> (i32, i32) {
    %c0_i32 = arith.constant 0 : i32
    %c0_i32_0 = arith.constant 0 : i32
    %c0_i32_1 = arith.constant 0 : i32
    return %c0_i32, %c0_i32_0 : i32, i32
  }
  func.func @transform_6(%arg0: i32) -> (i32, i32) {
    %c0_i32 = arith.constant 0 : i32
    %c0_i32_0 = arith.constant 0 : i32
    %c0_i32_1 = arith.constant 0 : i32
    return %c0_i32, %c0_i32_0 : i32, i32
  }
  func.func @transform_7(%arg0: i32) -> (i32, i32) {
    %c0_i32 = arith.constant 0 : i32
    %c0_i32_0 = arith.constant 0 : i32
    %c0_i32_1 = arith.constant 0 : i32
    return %c0_i32, %c0_i32_0 : i32, i32
  }
  func.func @transform_8(%arg0: i32) -> (i32, i32) {
    %c0_i32 = arith.constant 0 : i32
    %c0_i32_0 = arith.constant 0 : i32
    %c0_i32_1 = arith.constant 0 : i32
    return %c0_i32, %c0_i32_0 : i32, i32
  }
  func.func @transform_9(%arg0: i32) -> (i32, i32) {
    %c0_i32 = arith.constant 0 : i32
    %c0_i32_0 = arith.constant 0 : i32
    %c0_i32_1 = arith.constant 0 : i32
    return %c0_i32, %c0_i32_0 : i32, i32
  }
  func.func @transform_10(%arg0: i32) -> (i32, i32) {
    %c0_i32 = arith.constant 0 : i32
    %c0_i32_0 = arith.constant 0 : i32
    %c0_i32_1 = arith.constant 0 : i32
    return %c0_i32, %c0_i32_0 : i32, i32
  }
}

</mosaic_0001>

<bundles_post_ra>
// kernel: air_predictor_att_forward.1
= control target key start
LH: loop header
LB: loop body
LE: loop exit
PB: predicated region body
PF: predicated region fallthrough
CT: control target
= control target key end

     0   :  { %vm3079_vm0 = vmmov 0   ;;  %s4169_s1 = inlined_call_operand.vmem [shape: f32[128,128], index: 1, kind: input, shape index: {}]   ;;  %s4170_s0 = inlined_call_operand.vmem [shape: f32[64,128], index: 0, kind: input, shape index: {}]   ;;  %s4171_s3 = inlined_call_operand.vmem [shape: f32[128,512], index: 3, kind: input, shape index: {}]   ;;  %s4172_s2 = inlined_call_operand.vmem [shape: f32[1,128], index: 2, kind: input, shape index: {}]   ;;  %s4173_s4 = inlined_call_operand.vmem [shape: f32[128,512], index: 4, kind: input, shape index: {}]   ;;  %s4174_s5 = inlined_call_operand.vmem [shape: f32[1,512], index: 5, kind: input, shape index: {}]   ;;  %s4175_s6 = inlined_call_operand.vmem [shape: f32[1,128], index: 6, kind: input, shape index: {}]   ;;  %s4176_s7 = inlined_call_operand.vmem [shape: f32[128,128], index: 7, kind: input, shape index: {}]   ;;  %s4177_s8 = inlined_call_operand.vmem [shape: f32[128,128], index: 8, kind: input, shape index: {}]   ;;  %s4178_s9 = inlined_call_operand.vmem [shape: f32[1,128], index: 9, kind: input, shape index: {}]   ;;  %s4179_s10 = inlined_call_operand.vmem [shape: f32[8,128], index: 10, kind: output, shape index: {}]  }
   0x1   :  { %v43_v0 = vld [vmem:[%s4169_s1] sm:$0xff]  ;;  %v44_v1 = vld [vmem:[%s4169_s1 + $0x8] sm:$0xff]  ;;  %v45_v2 = vld [vmem:[%s4169_s1 + $0x10] sm:$0xff] }
   0x2   :  { %v2284_v3 = vpack.c.bf16 %v44_v1, %v43_v0  ;;  %v46_v4 = vld [vmem:[%s4169_s1 + $0x18] sm:$0xff]  ;;  %v47_v6 = vld [vmem:[%s4169_s1 + $0x20] sm:$0xff]  ;;  %v48_v7 = vld [vmem:[%s4169_s1 + $0x28] sm:$0xff] }
   0x3   :  { %v2288_v5 = vpack.c.bf16 %v46_v4, %v45_v2  ;;  %v2292_v8 = vpack.c.bf16 %v48_v7, %v47_v6  ;;  %v49_v9 = vld [vmem:[%s4169_s1 + $0x30] sm:$0xff]  ;;  %v35_v10 = vld [vmem:[%s4170_s0] sm:$0xff]  ;;  %v50_v11 = vld [vmem:[%s4169_s1 + $0x38] sm:$0xff] }
   0x4   :  { %2285 = vmatprep.subr.bf16.mxu0 %v2284_v3  ;;  %2202 = vmatprep.mubr.f32.mxu0 %v35_v10  ;;  %v172_v12 = vld [vmem:[%s4171_s3 + $0x8] sm:$0xff]  ;;  %v171_v15 = vld [vmem:[%s4171_s3] sm:$0xff]  ;;  %v2296_v19 = vpack.c.bf16 %v50_v11, %v49_v9  ;;  %v53_v32 = vld [vmem:[%s4169_s1 + $0x50] sm:$0xff] }
   0x5   :  { %2287 = vmatpush3.bf16.msra.mxu0 %v2284_v3  ;;  %v176_v13 = vld [vmem:[%s4171_s3 + $0x28] sm:$0xff]  ;;  %v175_v16 = vld [vmem:[%s4171_s3 + $0x20] sm:$0xff]  ;;  %v54_v34 = vld [vmem:[%s4169_s1 + $0x58] sm:$0xff] }
   0x6   :  { %2289 = vmatprep.subr.bf16.mxu0 %v2288_v5  ;;  %v2316_v14 = vpack.c.bf16 %v176_v13, %v172_v12  ;;  %v2318_v17 = vpack.c.bf16 %v175_v16, %v171_v15  ;;  %v180_v18 = vld [vmem:[%s4171_s3 + $0x48] sm:$0xff]  ;;  %v51_v20 = vld [vmem:[%s4169_s1 + $0x40] sm:$0xff]  ;;  %v2304_v42 = vpack.c.bf16 %v54_v34, %v53_v32  ;;  %v57_v53 = vld [vmem:[%s4169_s1 + $0x70] sm:$0xff] }
   0x7   :  { %v184_v21 = vld [vmem:[%s4171_s3 + $0x68] sm:$0xff]  ;;  %v179_v24 = vld [vmem:[%s4171_s3 + $0x40] sm:$0xff]  ;;  %v58_v54 = vld [vmem:[%s4169_s1 + $0x78] sm:$0xff] }
   0x8   :  { %2317 = vmatprep.subr.bf16.mxu1 %v2316_v14  ;;  %v52_v22 = vld [vmem:[%s4169_s1 + $0x48] sm:$0xff]  ;;  %v2320_v23 = vpack.c.bf16 %v184_v21, %v180_v18  ;;  %v183_v25 = vld [vmem:[%s4171_s3 + $0x60] sm:$0xff]  ;;  %v2312_v61 = vpack.c.bf16 %v58_v54, %v57_v53  ;;  %v174_v62 = vld [vmem:[%s4171_s3 + $0x18] sm:$0xff] }
   0x9   :  { %2291 = vmatpush3.bf16.msra.mxu0 %v2288_v5  ;;  %2319 = vmatpush1.bf16.msra.mxu1 %v2318_v17  ;;  %v2322_v26 = vpack.c.bf16 %v183_v25, %v179_v24  ;;  %v188_v27 = vld [vmem:[%s4171_s3 + $0x88] sm:$0xff]  ;;  %v187_v30 = vld [vmem:[%s4171_s3 + $0x80] sm:$0xff]  ;;  %v2300_v31 = vpack.c.bf16 %v52_v22, %v51_v20  ;;  %v178_v63 = vld [vmem:[%s4171_s3 + $0x38] sm:$0xff] }
   0xa   :  { %2293 = vmatprep.subr.bf16.mxu0 %v2292_v8  ;;  %v192_v28 = vld [vmem:[%s4171_s3 + $0xa8] sm:$0xff]  ;;  %2321 = vmatprep.subr.bf16.mxu1 %v2320_v23  ;;  %v191_v33 = vld [vmem:[%s4171_s3 + $0xa0] sm:$0xff]  ;;  %v2348_v4 = vpack.c.bf16 %v178_v63, %v174_v62  ;;  %v173_v5 = vld [vmem:[%s4171_s3 + $0x10] sm:$0xff] }
   0xb   :  { %v2324_v29 = vpack.c.bf16 %v192_v28, %v188_v27  ;;  %v2326_v35 = vpack.c.bf16 %v191_v33, %v187_v30  ;;  %v196_v36 = vld [vmem:[%s4171_s3 + $0xc8] sm:$0xff]  ;;  %v195_v39 = vld [vmem:[%s4171_s3 + $0xc0] sm:$0xff]  ;;  %v177_v6 = vld [vmem:[%s4171_s3 + $0x30] sm:$0xff] }
   0xc   :  { %v200_v37 = vld [vmem:[%s4171_s3 + $0xe8] sm:$0xff]  ;;  %v199_v40 = vld [vmem:[%s4171_s3 + $0xe0] sm:$0xff]  ;;  %v182_v7 = vld [vmem:[%s4171_s3 + $0x58] sm:$0xff]  ;;  %v2350_v11 = vpack.c.bf16 %v177_v6, %v173_v5 }
   0xd   :  { %2295 = vmatpush3.bf16.msra.mxu0 %v2292_v8  ;;  %2323 = vmatpush1.bf16.msra.mxu1 %v2322_v26  ;;  %v2328_v38 = vpack.c.bf16 %v200_v37, %v196_v36  ;;  %v204_v41 = vld [vmem:[%s4171_s3 + $0x108] sm:$0xff]  ;;  %v55_v44 = vld [vmem:[%s4169_s1 + $0x60] sm:$0xff]  ;;  %v2330_v46 = vpack.c.bf16 %v199_v40, %v195_v39  ;;  %v186_v8 = vld [vmem:[%s4171_s3 + $0x78] sm:$0xff] }
   0xe   :  { %2297 = vmatprep.subr.bf16.mxu0 %v2296_v19  ;;  %2325 = vmatprep.subr.bf16.mxu1 %v2324_v29  ;;  %v208_v43 = vld [vmem:[%s4171_s3 + $0x128] sm:$0xff]  ;;  %v203_v48 = vld [vmem:[%s4171_s3 + $0x100] sm:$0xff]  ;;  %v2352_v12 = vpack.c.bf16 %v186_v8, %v182_v7  ;;  %v181_v13 = vld [vmem:[%s4171_s3 + $0x50] sm:$0xff] }
   0xf   :  { %v56_v45 = vld [vmem:[%s4169_s1 + $0x68] sm:$0xff]  ;;  %v2332_v47 = vpack.c.bf16 %v208_v43, %v204_v41  ;;  %v207_v49 = vld [vmem:[%s4171_s3 + $0x120] sm:$0xff]  ;;  %v185_v14 = vld [vmem:[%s4171_s3 + $0x70] sm:$0xff] }
  0x10   :  { %v212_v50 = vld [vmem:[%s4171_s3 + $0x148] sm:$0xff]  ;;  %v2308_v52 = vpack.c.bf16 %v56_v45, %v55_v44  ;;  %v2334_v55 = vpack.c.bf16 %v207_v49, %v203_v48  ;;  %v211_v57 = vld [vmem:[%s4171_s3 + $0x140] sm:$0xff]  ;;  %v37_v15 = vld [vmem:[%s4170_s0 + $0x10] sm:$0xff]  ;;  %v2354_v18 = vpack.c.bf16 %v185_v14, %v181_v13 }
  0x11   :  { %2299 = vmatpush3.bf16.msra.mxu0 %v2296_v19  ;;  %2327 = vmatpush1.bf16.msra.mxu1 %v2326_v35  ;;  %v216_v51 = vld [vmem:[%s4171_s3 + $0x168] sm:$0xff]  ;;  %v215_v58 = vld [vmem:[%s4171_s3 + $0x160] sm:$0xff]  ;;  %v190_v16 = vld [vmem:[%s4171_s3 + $0x98] sm:$0xff] }
  0x12   :  { %2301 = vmatprep.subr.bf16.mxu0 %v2300_v31  ;;  %2329 = vmatprep.subr.bf16.mxu1 %v2328_v38  ;;  %v2336_v56 = vpack.c.bf16 %v216_v51, %v212_v50  ;;  %v220_v59 = vld [vmem:[%s4171_s3 + $0x188] sm:$0xff]  ;;  %v2338_v0 = vpack.c.bf16 %v215_v58, %v211_v57  ;;  %v219_v2 = vld [vmem:[%s4171_s3 + $0x180] sm:$0xff]  ;;  %v194_v17 = vld [vmem:[%s4171_s3 + $0xb8] sm:$0xff] }
  0x13   :  { %v224_v60 = vld [vmem:[%s4171_s3 + $0x1a8] sm:$0xff]  ;;  %v223_v3 = vld [vmem:[%s4171_s3 + $0x1a0] sm:$0xff]  ;;  %v38_v19 = vld [vmem:[%s4170_s0 + $0x18] sm:$0xff]  ;;  %v2356_v20 = vpack.c.bf16 %v194_v17, %v190_v16 }
  0x14   :  { %v2340_v1 = vpack.c.bf16 %v224_v60, %v220_v59  ;;  %v2342_v9 = vpack.c.bf16 %v223_v3, %v219_v2  ;;  %v36_v10 = vld [vmem:[%s4170_s0 + $0x8] sm:$0xff]  ;;  %v189_v21 = vld [vmem:[%s4171_s3 + $0x90] sm:$0xff]  ;;  %v39_v23 = vld [vmem:[%s4170_s0 + $0x20] sm:$0xff] }
  0x15   :  { %2303 = vmatpush3.bf16.msra.mxu0 %v2300_v31  ;;  %2331 = vmatpush1.bf16.msra.mxu1 %v2330_v46  ;;  %v193_v22 = vld [vmem:[%s4171_s3 + $0xb0] sm:$0xff]  ;;  %v198_v24 = vld [vmem:[%s4171_s3 + $0xd8] sm:$0xff]  ;;  %v40_v27 = vld [vmem:[%s4170_s0 + $0x28] sm:$0xff] }
  0x16   :  { %2305 = vmatprep.subr.bf16.mxu0 %v2304_v42  ;;  %2333 = vmatprep.subr.bf16.mxu1 %v2332_v47  ;;  %v202_v25 = vld [vmem:[%s4171_s3 + $0xf8] sm:$0xff]  ;;  %v2358_v26 = vpack.c.bf16 %v193_v22, %v189_v21  ;;  %v197_v29 = vld [vmem:[%s4171_s3 + $0xd0] sm:$0xff]  ;;  %v228_v51 = vld [vmem:[%s4171_s3 + $0x1c8] sm:$0xff] }
  0x17   :  { %v2360_v28 = vpack.c.bf16 %v202_v25, %v198_v24  ;;  %v201_v30 = vld [vmem:[%s4171_s3 + $0xf0] sm:$0xff]  ;;  %v206_v32 = vld [vmem:[%s4171_s3 + $0x118] sm:$0xff]  ;;  %v231_v57 = vld [vmem:[%s4171_s3 + $0x1e0] sm:$0xff] }
  0x18   :  { %v41_v31 = vld [vmem:[%s4170_s0 + $0x30] sm:$0xff]  ;;  %v210_v33 = vld [vmem:[%s4171_s3 + $0x138] sm:$0xff]  ;;  %v2362_v34 = vpack.c.bf16 %v201_v30, %v197_v29  ;;  %v515_v22 = vld [vmem:[%s4173_s4] sm:$0xff] }
  0x19   :  { %2307 = vmatpush3.bf16.msra.mxu0 %v2304_v42  ;;  %2335 = vmatpush1.bf16.msra.mxu1 %v2334_v55  ;;  %v2364_v35 = vpack.c.bf16 %v210_v33, %v206_v32  ;;  %v205_v36 = vld [vmem:[%s4171_s3 + $0x110] sm:$0xff]  ;;  %v214_v38 = vld [vmem:[%s4171_s3 + $0x158] sm:$0xff]  ;;  %v524_v30 = vld [vmem:[%s4173_s4 + $0x48] sm:$0xff] }
  0x1a   :  { %2309 = vmatprep.subr.bf16.mxu0 %v2308_v52  ;;  %2337 = vmatprep.subr.bf16.mxu1 %v2336_v56  ;;  %v209_v37 = vld [vmem:[%s4171_s3 + $0x130] sm:$0xff]  ;;  %v218_v39 = vld [vmem:[%s4171_s3 + $0x178] sm:$0xff]  ;;  %v227_v56 = vld [vmem:[%s4171_s3 + $0x1c0] sm:$0xff] }
  0x1b   :  { %v2366_v40 = vpack.c.bf16 %v209_v37, %v205_v36  ;;  %v2368_v41 = vpack.c.bf16 %v218_v39, %v214_v38  ;;  %v213_v42 = vld [vmem:[%s4171_s3 + $0x150] sm:$0xff]  ;;  %v222_v44 = vld [vmem:[%s4171_s3 + $0x198] sm:$0xff]  ;;  %v2346_v60 = vpack.c.bf16 %v231_v57, %v227_v56 }
  0x1c   :  { %v217_v43 = vld [vmem:[%s4171_s3 + $0x170] sm:$0xff]  ;;  %v226_v45 = vld [vmem:[%s4171_s3 + $0x1b8] sm:$0xff] }
  0x1d   :  { %2311 = vmatpush3.bf16.msra.mxu0 %v2308_v52  ;;  %2339 = vmatpush1.bf16.msra.mxu1 %v2338_v0  ;;  %v2370_v46 = vpack.c.bf16 %v217_v43, %v213_v42  ;;  %v2372_v47 = vpack.c.bf16 %v226_v45, %v222_v44  ;;  %v221_v48 = vld [vmem:[%s4171_s3 + $0x190] sm:$0xff]  ;;  %v232_v52 = vld [vmem:[%s4171_s3 + $0x1e8] sm:$0xff]  ;;  %v230_v53 = vld [vmem:[%s4171_s3 + $0x1d8] sm:$0xff]  ;;  %v3077_v0 = vmov 0.0  }
  0x1e   :  { %2313 = vmatprep.subr.bf16.mxu0 %v2312_v61  ;;  %2341 = vmatprep.subr.bf16.mxu1 %v2340_v1  ;;  %v225_v49 = vld [vmem:[%s4171_s3 + $0x1b0] sm:$0xff]  ;;  %v2344_v54 = vpack.c.bf16 %v232_v52, %v228_v51  ;;  %v234_v55 = vld [vmem:[%s4171_s3 + $0x1f8] sm:$0xff]  ;;  %v2086_v1 = vld [vmem:[%s4172_s2] ss:$0 sm:$0xff] }
  0x1f   :  { %v2374_v50 = vpack.c.bf16 %v225_v49, %v221_v48  ;;  %v42_v58 = vld [vmem:[%s4170_s0 + $0x38] sm:$0xff]  ;;  %v2376_v59 = vpack.c.bf16 %v234_v55, %v230_v53  ;;  %v233_v62 = vld [vmem:[%s4171_s3 + $0x1f0] sm:$0xff]  ;;  %321 = vmatprep.mubr.f32.mxu1 %v3077_v0  ;;  %v532_v42 = vld [vmem:[%s4173_s4 + $0x88] sm:$0xff] }
  0x20   :  { %v522_v24 = vld [vmem:[%s4173_s4 + $0x38] sm:$0xff]  ;;  %v525_v39 = vld [vmem:[%s4173_s4 + $0x50] sm:$0xff]  ;;  %v536_v43 = vld [vmem:[%s4173_s4 + $0xa8] sm:$0xff] }
  0x21   :  { %2315 = vmatpush3.bf16.msra.mxu0 %v2312_v61  ;;  %2343 = vmatpush1.bf16.msra.mxu1 %v2342_v9  ;;  %v229_v61 = vld [vmem:[%s4171_s3 + $0x1d0] sm:$0xff]  ;;  %v526_v32 = vld [vmem:[%s4173_s4 + $0x58] sm:$0xff]  ;;  %v3501_v45 = vpack.c.bf16 %v536_v43, %v532_v42  ;;  %v544_v55 = vld [vmem:[%s4173_s4 + $0xe8] sm:$0xff] }
  0x22   :  { %2349 = vmatprep.subr.bf16.mxu0 %v2348_v4  ;;  %2345 = vmatprep.subr.bf16.mxu1 %v2344_v54  ;;  %v2378_v63 = vpack.c.bf16 %v233_v62, %v229_v61  ;;  %v530_v36 = vld [vmem:[%s4173_s4 + $0x78] sm:$0xff]  ;;  %v533_v51 = vld [vmem:[%s4173_s4 + $0x90] sm:$0xff]  ;;  %v540_v54 = vld [vmem:[%s4173_s4 + $0xc8] sm:$0xff] }
  0x23   :  { %v3478_v38 = vpack.c.bf16 %v530_v36, %v526_v32  ;;  %v534_v44 = vld [vmem:[%s4173_s4 + $0x98] sm:$0xff]  ;;  %v537_v52 = vld [vmem:[%s4173_s4 + $0xb0] sm:$0xff]  ;;  %v3537_v57 = vpack.c.bf16 %v544_v55, %v540_v54  ;;  %v568_v32 = vld [vmem:[%s4173_s4 + $0x1a8] sm:$0xff] }
  0x24   :  { %2203 = vmatmul.mubr.f32.vlgmr.msra.gmra.mrb[0].mxu0 %v36_v10  ;;  %v538_v48 = vld [vmem:[%s4173_s4 + $0xb8] sm:$0xff]  ;;  %v3523_v53 = vpack.c.bf16 %v537_v52, %v533_v51  ;;  %v565_v43 = vld [vmem:[%s4173_s4 + $0x190] sm:$0xff]  ;;  %v571_v54 = vld [vmem:[%s4173_s4 + $0x1c0] sm:$0xff] }
  0x25   :  { %2351 = vmatpush1.bf16.msra.mxu0 %v2350_v11  ;;  %2205 = vmatprep.mubr.f32.mxu0 %v37_v15  ;;  %v542_v56 = vld [vmem:[%s4173_s4 + $0xd8] sm:$0xff]  ;;  %v575_v55 = vld [vmem:[%s4173_s4 + $0x1e0] sm:$0xff] }
  0x26   :  { %2353 = vmatprep.subr.bf16.mxu0 %v2352_v12  ;;  %2347 = vmatpush1.bf16.msra.mxu1 %v2346_v60  ;;  %v546_v60 = vld [vmem:[%s4173_s4 + $0xf8] sm:$0xff] }
  0x27   :  { %v3550_v62 = vpack.c.bf16 %v546_v60, %v542_v56  ;;  %v570_v42 = vld [vmem:[%s4173_s4 + $0x1b8] sm:$0xff]  ;;  %v577_v60 = vld [vmem:[%s4173_s4 + $0x1f0] sm:$0xff] }
  0x28   :  { %2206 = vmatmul.mubr.f32.gmra.mrb[2].mxu0 %v38_v19  ;;  %v520_v19 = vld [vmem:[%s4173_s4 + $0x28] sm:$0xff]  ;;  %v574_v56 = vld [vmem:[%s4173_s4 + $0x1d8] sm:$0xff] }
  0x29   :  { %2355 = vmatpush1.bf16.msra.mxu0 %v2354_v18  ;;  %2208 = vmatprep.mubr.f32.mxu0 %v39_v23  ;;  %v516_v18 = vld [vmem:[%s4173_s4 + $0x8] sm:$0xff]  ;;  %v519_v23 = vld [vmem:[%s4173_s4 + $0x20] sm:$0xff] }
  0x2a   :  { %2357 = vmatprep.subr.bf16.mxu0 %v2356_v20  ;;  %v518_v20 = vld [vmem:[%s4173_s4 + $0x18] sm:$0xff]  ;;  %v3429_v21 = vpack.c.bf16 %v520_v19, %v516_v18  ;;  %v3440_v25 = vpack.c.bf16 %v519_v23, %v515_v22  ;;  %v555_v19 = vld [vmem:[%s4173_s4 + $0x140] sm:$0xff] }
  0x2b   :  { %v562_v22 = vld [vmem:[%s4173_s4 + $0x178] sm:$0xff] }
  0x2c   :  { %2209 = vmatmul.mubr.f32.gmra.mrb[4].mxu0 %v40_v27  ;;  %v517_v27 = vld [vmem:[%s4173_s4 + $0x10] sm:$0xff]  ;;  %2381 = vmatprep.subr.bf16.mxu1 %v3429_v21 }
  0x2d   :  { %2359 = vmatpush1.bf16.msra.mxu0 %v2358_v26  ;;  %2211 = vmatprep.mubr.f32.mxu0 %v41_v31  ;;  %v3442_v26 = vpack.c.bf16 %v522_v24, %v518_v20  ;;  %v528_v31 = vld [vmem:[%s4173_s4 + $0x68] sm:$0xff]  ;;  %v559_v20 = vld [vmem:[%s4173_s4 + $0x160] sm:$0xff] }
  0x2e   :  { %2361 = vmatprep.subr.bf16.mxu0 %v2360_v28  ;;  %v521_v28 = vld [vmem:[%s4173_s4 + $0x30] sm:$0xff]  ;;  %v3465_v33 = vpack.c.bf16 %v528_v31, %v524_v30  ;;  %v3620_v23 = vpack.c.bf16 %v559_v20, %v555_v19  ;;  %v564_v30 = vld [vmem:[%s4173_s4 + $0x188] sm:$0xff] }
  0x2f   :  { %v3451_v29 = vpack.c.bf16 %v521_v28, %v517_v27  ;;  %v557_v27 = vld [vmem:[%s4173_s4 + $0x150] sm:$0xff]  ;;  %v3647_v36 = vpack.c.bf16 %v568_v32, %v564_v30 }
  0x30   :  { %2212 = vmatmul.mubr.f32.gmra.mrb[6].mxu0 %v42_v58  ;;  %v539_v58 = vld [vmem:[%s4173_s4 + $0xc0] sm:$0xff]  ;;  %v561_v28 = vld [vmem:[%s4173_s4 + $0x170] sm:$0xff] }
  0x31   :  { %2363 = vmatpush1.bf16.msra.mxu0 %v2362_v34  ;;  %434 = vmatprep.mubr.f32.mxu0 %v3077_v0  ;;  %v523_v34 = vld [vmem:[%s4173_s4 + $0x40] sm:$0xff]  ;;  %v3634_v31 = vpack.c.bf16 %v561_v28, %v557_v27 }
  0x32   :  { %2365 = vmatprep.subr.bf16.mxu0 %v2364_v35  ;;  %v527_v35 = vld [vmem:[%s4173_s4 + $0x60] sm:$0xff] }
  0x33   :  { %v3476_v37 = vpack.c.bf16 %v527_v35, %v523_v34  ;;  %v563_v34 = vld [vmem:[%s4173_s4 + $0x180] sm:$0xff] }
  0x34   :  { %v567_v35 = vld [vmem:[%s4173_s4 + $0x1a0] sm:$0xff] }
  0x35   :  { %2367 = vmatpush1.bf16.msra.mxu0 %v2366_v40  ;;  %v529_v40 = vld [vmem:[%s4173_s4 + $0x70] sm:$0xff] }
  0x36   :  { %2369 = vmatprep.subr.bf16.mxu0 %v2368_v41  ;;  %v3487_v41 = vpack.c.bf16 %v529_v40, %v525_v39  ;;  %v3649_v39 = vpack.c.bf16 %v567_v35, %v563_v34  ;;  %v566_v40 = vld [vmem:[%s4173_s4 + $0x198] sm:$0xff] }
  0x39   :  { %2371 = vmatpush1.bf16.msra.mxu0 %v2370_v46  ;;  %v531_v46 = vld [vmem:[%s4173_s4 + $0x80] sm:$0xff] }
  0x3a   :  { %2373 = vmatprep.subr.bf16.mxu0 %v2372_v47  ;;  %v535_v47 = vld [vmem:[%s4173_s4 + $0xa0] sm:$0xff] }
  0x3b   :  { %v3512_v49 = vpack.c.bf16 %v535_v47, %v531_v46  ;;  %v569_v46 = vld [vmem:[%s4173_s4 + $0x1b0] sm:$0xff]  ;;  %v572_v47 = vld [vmem:[%s4173_s4 + $0x1c8] sm:$0xff] }
  0x3c   :  { %v3673_v51 = vpack.c.bf16 %v569_v46, %v565_v43 }
  0x3d   :  { %2375 = vmatpush1.bf16.msra.mxu0 %v2374_v50  ;;  %v3514_v50 = vpack.c.bf16 %v538_v48, %v534_v44  ;;  %v3661_v44 = vpack.c.bf16 %v570_v42, %v566_v40  ;;  %v576_v48 = vld [vmem:[%s4173_s4 + $0x1e8] sm:$0xff] }
  0x3e   :  { %2377 = vmatprep.subr.bf16.mxu0 %v2376_v59  ;;  %v543_v59 = vld [vmem:[%s4173_s4 + $0xe0] sm:$0xff]  ;;  %v3675_v52 = vpack.c.bf16 %v576_v48, %v572_v47 }
  0x3f   :  { %v3548_v61 = vpack.c.bf16 %v543_v59, %v539_v58  ;;  %v578_v58 = vld [vmem:[%s4173_s4 + $0x1f8] sm:$0xff]  ;;  %v573_v59 = vld [vmem:[%s4173_s4 + $0x1d0] sm:$0xff] }
  0x41   :  { %2379 = vmatpush1.bf16.msra.mxu0 %v2378_v63  ;;  %v541_v63 = vld [vmem:[%s4173_s4 + $0xd0] sm:$0xff] }
  0x42   :  { %2413 = vmatprep.subr.bf16.mxu0 %v3442_v26 }
  0xf7   :  { %v2204_v2 = vpop.f32.mrb[0].mxu0 }
  0xf8   :  { %v132_v3 = vpop.f32.mrb[1].mxu0  ;;  %v138_v7 = vadd.f32 %v2204_v2, %v2086_v1 }
  0xf9   :  { %v133_v4 = vadd.f32 %v2086_v1, %v132_v3  ;;  %v548_v3 = vld [vmem:[%s4173_s4 + $0x108] sm:$0xff] }
  0xfb   :  { %322 = vmatmul.mubr.f32.vlgmr.msra.gmra.mrb[0].mxu1 %v133_v4  ;;  %435 = vmatmul.mubr.f32.vlgmr.msra.gmra.mrb[8].mxu0 %v133_v4  ;;  %v2207_v5 = vpop.f32.mrb[2].mxu0  ;;  %v552_v4 = vld [vmem:[%s4173_s4 + $0x128] sm:$0xff] }
  0xfc   :  { %327 = vmatprep.mubr.f32.mxu1 %v3077_v0  ;;  %440 = vmatprep.mubr.f32.mxu0 %v3077_v0  ;;  %v142_v6 = vpop.f32.mrb[3].mxu0  ;;  %v148_v11 = vadd.f32 %v2207_v5, %v2086_v1  ;;  %v550_v5 = vld [vmem:[%s4173_s4 + $0x118] sm:$0xff] }
  0xfd   :  { %v143_v8 = vadd.f32 %v2086_v1, %v142_v6  ;;  %2383 = vmatpush1.bf16.msra.mxu1 %v3440_v25  ;;  %2415 = vmatpush1.bf16.msra.mxu0 %v3451_v29  ;;  %v3573_v6 = vpack.c.bf16 %v552_v4, %v548_v3  ;;  %v3703_v3 = vpack.c.bf16 %v577_v60, %v573_v59  ;;  %v237_v4 = vlaneseq }
  0xfe   :  { %2385 = vmatprep.subr.bf16.mxu1 %v3465_v33  ;;  %2417 = vmatprep.subr.bf16.mxu0 %v3478_v38 }
  0xff   :  { %328 = vmatmul.mubr.f32.gmra.mrb[2].mxu1 %v138_v7  ;;  %441 = vmatmul.mubr.f32.gmra.mrb[10].mxu0 %v138_v7  ;;  %v2210_v9 = vpop.f32.mrb[4].mxu0  ;;  %v547_v7 = vld [vmem:[%s4173_s4 + $0x100] sm:$0xff] }
 0x100   :  { %333 = vmatprep.mubr.f32.mxu1 %v3077_v0  ;;  %446 = vmatprep.mubr.f32.mxu0 %v3077_v0  ;;  %v152_v10 = vpop.f32.mrb[5].mxu0  ;;  %v158_v13 = vadd.f32 %v2210_v9, %v2086_v1  ;;  %v554_v9 = vld [vmem:[%s4173_s4 + $0x138] sm:$0xff] }
 0x101   :  { %v153_v12 = vadd.f32 %v2086_v1, %v152_v10  ;;  %2387 = vmatpush1.bf16.msra.mxu1 %v3476_v37  ;;  %2419 = vmatpush1.bf16.msra.mxu0 %v3487_v41 }
 0x102   :  { %2389 = vmatprep.subr.bf16.mxu1 %v3501_v45  ;;  %2421 = vmatprep.subr.bf16.mxu0 %v3514_v50 }
 0x103   :  { %334 = vmatmul.mubr.f32.gmra.mrb[4].mxu1 %v143_v8  ;;  %447 = vmatmul.mubr.f32.gmra.mrb[12].mxu0 %v143_v8  ;;  %v2213_v14 = vpop.f32.mrb[6].mxu0  ;;  %v551_v8 = vld [vmem:[%s4173_s4 + $0x120] sm:$0xff] }
 0x104   :  { %339 = vmatprep.mubr.f32.mxu1 %v3077_v0  ;;  %452 = vmatprep.mubr.f32.mxu0 %v3077_v0  ;;  %v162_v15 = vpop.f32.mrb[7].mxu0  ;;  %v168_v17 = vadd.f32 %v2213_v14, %v2086_v1  ;;  %v3584_v10 = vpack.c.bf16 %v551_v8, %v547_v7  ;;  %v3716_v8 = vld [vmem:[%s4174_s5] sm:$0xf] }
 0x105   :  { %v163_v16 = vadd.f32 %v2086_v1, %v162_v15  ;;  %2391 = vmatpush1.bf16.msra.mxu1 %v3512_v49  ;;  %2423 = vmatpush1.bf16.msra.mxu0 %v3523_v53  ;;  %v545_v1 = vld [vmem:[%s4173_s4 + $0xf0] sm:$0xff]  ;;  %v556_v15 = vld [vmem:[%s4173_s4 + $0x148] sm:$0xff] }
 0x106   :  { %2393 = vmatprep.subr.bf16.mxu1 %v3537_v57  ;;  %v3559_v2 = vpack.c.bf16 %v545_v1, %v541_v63  ;;  %2425 = vmatprep.subr.bf16.mxu0 %v3550_v62  ;;  %v3697_v63 = vpack.c.bf16 %v575_v55, %v571_v54  ;;  %v3699_v1 = vpack.c.bf16 %v578_v58, %v574_v56  ;;  %v3738_v56 = vld [vmem:[%s4175_s6] ss:$0 sm:$0xff] }
 0x107   :  { %340 = vmatmul.mubr.f32.gmra.mrb[6].mxu1 %v148_v11  ;;  %453 = vmatmul.mubr.f32.gmra.mrb[14].mxu0 %v148_v11  ;;  %v3586_v11 = vpack.c.bf16 %v554_v9, %v550_v5  ;;  %v3710_v5 = vshrl.u32 %v237_v4, 7 }
 0x108   :  { %345 = vmatprep.mubr.f32.mxu1 %v3077_v0  ;;  %458 = vmatprep.mubr.f32.mxu0 %v3077_v0 }
 0x109   :  { %2395 = vmatpush1.bf16.msra.mxu1 %v3548_v61  ;;  %2427 = vmatpush1.bf16.msra.mxu0 %v3559_v2  ;;  %v239_v7 = vsub.s32 0, %v3710_v5  ;;  %v251_v28 = vsub.s32 3, %v3710_v5  ;;  %v243_v60 = vsub.s32 1, %v3710_v5 }
 0x10a   :  { %2397 = vmatprep.subr.bf16.mxu1 %v3573_v6  ;;  %2429 = vmatprep.subr.bf16.mxu0 %v3586_v11 }
 0x10b   :  { %346 = vmatmul.mubr.f32.gmra.mrb[8].mxu1 %v153_v12  ;;  %459 = vmatmul.mubr.f32.gmra.mrb[16].mxu0 %v153_v12  ;;  %v549_v12 = vld [vmem:[%s4173_s4 + $0x110] sm:$0xff]  ;;  %v3719_v9 = vrot.slane %v3716_v8, %v239_v7  ;;  %v3729_v32 = vrot.slane %v3716_v8, %v251_v28  ;;  %v3782_v4 = vrot.slane %v3716_v8, %v243_v60 }
 0x10c   :  { %351 = vmatprep.mubr.f32.mxu1 %v3077_v0  ;;  %464 = vmatprep.mubr.f32.mxu0 %v3077_v0 }
 0x10d   :  { %2399 = vmatpush1.bf16.msra.mxu1 %v3584_v10 }
 0x10f   :  { %352 = vmatmul.mubr.f32.gmra.mrb[10].mxu1 %v158_v13  ;;  %465 = vmatmul.mubr.f32.gmra.mrb[18].mxu0 %v158_v13  ;;  %v553_v13 = vld [vmem:[%s4173_s4 + $0x130] sm:$0xff] }
 0x110   :  { %357 = vmatprep.mubr.f32.mxu1 %v3077_v0  ;;  %470 = vmatprep.mubr.f32.mxu0 %v3077_v0  ;;  %v3595_v14 = vpack.c.bf16 %v553_v13, %v549_v12  ;;  %v247_v12 = vsub.s32 2, %v3710_v5 }
 0x112   :  { %2431 = vmatpush1.bf16.msra.mxu0 %v3595_v14 }
 0x113   :  { %358 = vmatmul.mubr.f32.gmra.mrb[12].mxu1 %v163_v16  ;;  %471 = vmatmul.mubr.f32.gmra.mrb[20].mxu0 %v163_v16  ;;  %v560_v16 = vld [vmem:[%s4173_s4 + $0x168] sm:$0xff] }
 0x114   :  { %363 = vmatprep.mubr.f32.mxu1 %v3077_v0  ;;  %476 = vmatprep.mubr.f32.mxu0 %v3077_v0  ;;  %v3609_v18 = vpack.c.bf16 %v560_v16, %v556_v15 }
 0x116   :  { %2401 = vmatprep.subr.bf16.mxu1 %v3609_v18 }
 0x117   :  { %364 = vmatmul.mubr.f32.gmra.mrb[14].mxu1 %v168_v17  ;;  %477 = vmatmul.mubr.f32.gmra.mrb[22].mxu0 %v168_v17  ;;  %v558_v17 = vld [vmem:[%s4173_s4 + $0x158] sm:$0xff] }
 0x118   :  { %666 = vmatprep.mubr.f32.mxu1 %v3077_v0  ;;  %737 = vmatprep.mubr.f32.mxu0 %v3077_v0  ;;  %v3622_v24 = vpack.c.bf16 %v562_v22, %v558_v17  ;;  %v3724_v17 = vrot.slane %v3716_v8, %v247_v12 }
 0x119   :  { %2403 = vmatpush1.bf16.msra.mxu1 %v3620_v23 }
 0x11a   :  { %2433 = vmatprep.subr.bf16.mxu0 %v3622_v24  ;;  %2405 = vmatprep.subr.bf16.mxu1 %v3647_v36 }
 0x11b   :  { %2435 = vmatpush1.bf16.msra.mxu0 %v3634_v31 }
 0x11c   :  { %2437 = vmatprep.subr.bf16.mxu0 %v3661_v44 }
 0x11d   :  { %2407 = vmatpush1.bf16.msra.mxu1 %v3649_v39 }
 0x11e   :  { %2409 = vmatprep.subr.bf16.mxu1 %v3675_v52 }
 0x11f   :  { %2439 = vmatpush1.bf16.msra.mxu0 %v3673_v51 }
 0x120   :  { %2441 = vmatprep.subr.bf16.mxu0 %v3699_v1 }
 0x121   :  { %2411 = vmatpush1.bf16.msra.mxu1 %v3697_v63 }
 0x122   :  { %2445 = vmatprep.subr.bf16.mxu1 %v3429_v21 }
 0x123   :  { %2443 = vmatpush1.bf16.msra.mxu0 %v3703_v3 }
 0x124   :  { %2477 = vmatprep.subr.bf16.mxu0 %v3442_v26 }
 0x1ce   :  { %v323_v13 = vpop.f32.mrb[0].mxu1  ;;  %v436_v15 = vpop.f32.mrb[8].mxu0 }
 0x1cf   :  { %v324_v16 = vadd.f32 %v323_v13, %v3719_v9  ;;  %v325_v19 = vpop.f32.mrb[1].mxu1  ;;  %v438_v20 = vpop.f32.mrb[9].mxu0  ;;  %v437_v27 = vadd.f32 %v436_v15, %v3724_v17 }
 0x1d0   :  { %v439_v34 = vadd.f32 %v438_v20, %v3729_v32 }
 0x1d1   :  { %v2087_v22 = vmul.f32 -1.442695, %v324_v16  ;;  %v2088_v30 = vmul.f32 -1.442695, %v437_v27 }
 0x1d3   :  { %2935 = vpow2.f32 %v2087_v22 }
 0x1d4   :  { %2937 = vpow2.f32 %v2088_v30 }
 0x1d5   :  { %2939 = vtanh.f32 %v439_v34 }
 0x1dd   :  { %v2936_v35 = vpop.eup %2935 }
 0x1de   :  { %v588_v40 = vadd.f32 1.0, %v2936_v35  ;;  %v2938_v42 = vpop.eup %2937 }
 0x1df   :  { %v589_v43 = vadd.f32 1.0, %v2938_v42  ;;  %v2940_v46 = vpop.eup %2939 }
 0x1e0   :  { %2941 = vrcp.f32 %v588_v40 }
 0x1e1   :  { %2943 = vrcp.f32 %v589_v43 }
 0x1ea   :  { %v2942_v47 = vpop.eup %2941 }
 0x1eb   :  { %v3732_v48 = vmul.f32 %v2942_v47, %v2940_v46  ;;  %v2944_v54 = vpop.eup %2943 }
 0x1ed   :  { %2945 = vtanh.f32 %v3732_v48 }
 0x1f7   :  { %v2946_v55 = vpop.eup %2945 }
 0x1f8   :  { %v3740_v58 = vmul.f32 %v2946_v55, %v2944_v54 }
 0x1fa   :  { %667 = vmatmul.mubr.f32.vlgmr.msra.gmra.mrb[2].mxu1 %v3740_v58  ;;  %738 = vmatmul.mubr.f32.vlgmr.msra.gmra.mrb[10].mxu0 %v3740_v58  ;;  %v1823_v59 = vmul.f32 %v3738_v56, %v3740_v58 }
 0x1fb   :  { %2447 = vmatpush1.bf16.msra.mxu1 %v3440_v25  ;;  %2479 = vmatpush1.bf16.msra.mxu0 %v3451_v29 }
 0x1fc   :  { %1824 = vadd.xlane.f32.xlu0 %v1823_v59  ;;  %2449 = vmatprep.subr.bf16.mxu1 %v3465_v33 }
 0x1fd   :  { %2481 = vmatprep.subr.bf16.mxu0 %v3478_v38  ;;  %840 = vmatprep.mubr.f32.mxu1 %v3077_v0 }
 0x1fe   :  { %911 = vmatprep.mubr.f32.mxu0 %v3077_v0 }
 0x1ff   :  { %2451 = vmatpush1.bf16.msra.mxu1 %v3476_v37  ;;  %2483 = vmatpush1.bf16.msra.mxu0 %v3487_v41 }
 0x200   :  { %2453 = vmatprep.subr.bf16.mxu1 %v3501_v45  ;;  %2485 = vmatprep.subr.bf16.mxu0 %v3514_v50 }
 0x203   :  { %2455 = vmatpush1.bf16.msra.mxu1 %v3512_v49  ;;  %2487 = vmatpush1.bf16.msra.mxu0 %v3523_v53 }
 0x204   :  { %2457 = vmatprep.subr.bf16.mxu1 %v3537_v57  ;;  %2489 = vmatprep.subr.bf16.mxu0 %v3550_v62 }
 0x207   :  { %2459 = vmatpush1.bf16.msra.mxu1 %v3548_v61  ;;  %2491 = vmatpush1.bf16.msra.mxu0 %v3559_v2 }
 0x208   :  { %2461 = vmatprep.subr.bf16.mxu1 %v3573_v6  ;;  %2493 = vmatprep.subr.bf16.mxu0 %v3586_v11 }
 0x20b   :  { %2463 = vmatpush1.bf16.msra.mxu1 %v3584_v10  ;;  %2495 = vmatpush1.bf16.msra.mxu0 %v3595_v14 }
 0x20c   :  { %2465 = vmatprep.subr.bf16.mxu1 %v3609_v18  ;;  %2497 = vmatprep.subr.bf16.mxu0 %v3622_v24 }
 0x20f   :  { %2467 = vmatpush1.bf16.msra.mxu1 %v3620_v23  ;;  %2499 = vmatpush1.bf16.msra.mxu0 %v3634_v31 }
 0x210   :  { %2469 = vmatprep.subr.bf16.mxu1 %v3647_v36  ;;  %2501 = vmatprep.subr.bf16.mxu0 %v3661_v44 }
 0x213   :  { %2471 = vmatpush1.bf16.msra.mxu1 %v3649_v39  ;;  %2503 = vmatpush1.bf16.msra.mxu0 %v3673_v51 }
 0x214   :  { %2473 = vmatprep.subr.bf16.mxu1 %v3675_v52  ;;  %2505 = vmatprep.subr.bf16.mxu0 %v3699_v1 }
 0x217   :  { %2475 = vmatpush1.bf16.msra.mxu1 %v3697_v63  ;;  %2507 = vmatpush1.bf16.msra.mxu0 %v3703_v3 }
 0x218   :  { %2509 = vmatprep.subr.bf16.mxu1 %v3429_v21  ;;  %2541 = vmatprep.subr.bf16.mxu0 %v3442_v26 }
 0x2cd   :  { %v668_v7 = vpop.f32.mrb[2].mxu1  ;;  %v739_v12 = vpop.f32.mrb[10].mxu0 }
 0x2ce   :  { %v2876_v13 = vadd.f32 %v668_v7, %v3719_v9  ;;  %v670_v15 = vpop.f32.mrb[3].mxu1  ;;  %v741_v16 = vpop.f32.mrb[11].mxu0  ;;  %v2890_v27 = vadd.f32 %v739_v12, %v3724_v17 }
 0x2cf   :  { %v2877_v19 = vadd.f32 %v670_v15, %v3782_v4  ;;  %v2891_v28 = vadd.f32 %v741_v16, %v3729_v32 }
 0x2d0   :  { %v2089_v20 = vmul.f32 -1.442695, %v2876_v13  ;;  %v2091_v5 = vmul.f32 -1.442695, %v2890_v27 }
 0x2d1   :  { %v2090_v22 = vmul.f32 -1.442695, %v2877_v19 }
 0x2d2   :  { %2947 = vpow2.f32 %v2089_v20 }
 0x2d3   :  { %2949 = vpow2.f32 %v2090_v22 }
 0x2d4   :  { %2951 = vtanh.f32 %v2891_v28 }
 0x2d5   :  { %2953 = vpow2.f32 %v2091_v5 }
 0x2dc   :  { %v2948_v30 = vpop.eup %2947 }
 0x2dd   :  { %v757_v8 = vadd.f32 1.0, %v2948_v30  ;;  %v2950_v34 = vpop.eup %2949 }
 0x2de   :  { %v758_v35 = vadd.f32 1.0, %v2950_v34  ;;  %v2952_v40 = vpop.eup %2951 }
 0x2df   :  { %2955 = vrcp.f32 %v757_v8  ;;  %v2954_v42 = vpop.eup %2953 }
 0x2e0   :  { %2957 = vrcp.f32 %v758_v35  ;;  %v759_v54 = vadd.f32 1.0, %v2954_v42 }
 0x2e2   :  { %2959 = vrcp.f32 %v759_v54 }
 0x2e9   :  { %v2956_v43 = vpop.eup %2955 }
 0x2ea   :  { %v768_v46 = vmul.f32 %v2956_v43, %v2952_v40  ;;  %v2958_v47 = vpop.eup %2957 }
 0x2eb   :  { %v767_v55 = vmul.f32 %v2958_v47, %v3732_v48 }
 0x2ec   :  { %v2960_v60 = vpop.eup %2959 }
 0x2ed   :  { %v3789_v59 = vadd.f32 %v768_v46, %v767_v55 }
 0x2ef   :  { %2961 = vtanh.f32 %v3789_v59 }
 0x2f9   :  { %v2962_v7 = vpop.eup %2961 }
 0x2fa   :  { %v3792_v12 = vmul.f32 %v2962_v7, %v2960_v60 }
 0x2fc   :  { %841 = vmatmul.mubr.f32.vlgmr.msra.gmra.mrb[4].mxu1 %v3792_v12  ;;  %912 = vmatmul.mubr.f32.vlgmr.msra.gmra.mrb[12].mxu0 %v3792_v12  ;;  %v1826_v13 = vmul.f32 %v3738_v56, %v3792_v12 }
 0x2fd   :  { %2511 = vmatpush1.bf16.msra.mxu1 %v3440_v25  ;;  %2543 = vmatpush1.bf16.msra.mxu0 %v3451_v29 }
 0x2fe   :  { %1827 = vadd.xlane.f32.xlu0 %v1826_v13  ;;  %2513 = vmatprep.subr.bf16.mxu1 %v3465_v33 }
 0x2ff   :  { %2545 = vmatprep.subr.bf16.mxu0 %v3478_v38  ;;  %1014 = vmatprep.mubr.f32.mxu1 %v3077_v0 }
 0x300   :  { %1085 = vmatprep.mubr.f32.mxu0 %v3077_v0 }
 0x301   :  { %2515 = vmatpush1.bf16.msra.mxu1 %v3476_v37  ;;  %2547 = vmatpush1.bf16.msra.mxu0 %v3487_v41 }
 0x302   :  { %2517 = vmatprep.subr.bf16.mxu1 %v3501_v45  ;;  %2549 = vmatprep.subr.bf16.mxu0 %v3514_v50 }
 0x305   :  { %2519 = vmatpush1.bf16.msra.mxu1 %v3512_v49  ;;  %2551 = vmatpush1.bf16.msra.mxu0 %v3523_v53 }
 0x306   :  { %2521 = vmatprep.subr.bf16.mxu1 %v3537_v57  ;;  %2553 = vmatprep.subr.bf16.mxu0 %v3550_v62 }
 0x309   :  { %2523 = vmatpush1.bf16.msra.mxu1 %v3548_v61  ;;  %2555 = vmatpush1.bf16.msra.mxu0 %v3559_v2 }
 0x30a   :  { %2525 = vmatprep.subr.bf16.mxu1 %v3573_v6  ;;  %2557 = vmatprep.subr.bf16.mxu0 %v3586_v11 }
 0x30d   :  { %2527 = vmatpush1.bf16.msra.mxu1 %v3584_v10  ;;  %2559 = vmatpush1.bf16.msra.mxu0 %v3595_v14 }
 0x30e   :  { %2529 = vmatprep.subr.bf16.mxu1 %v3609_v18  ;;  %2561 = vmatprep.subr.bf16.mxu0 %v3622_v24 }
 0x311   :  { %2531 = vmatpush1.bf16.msra.mxu1 %v3620_v23  ;;  %2563 = vmatpush1.bf16.msra.mxu0 %v3634_v31 }
 0x312   :  { %2533 = vmatprep.subr.bf16.mxu1 %v3647_v36  ;;  %2565 = vmatprep.subr.bf16.mxu0 %v3661_v44 }
 0x315   :  { %2535 = vmatpush1.bf16.msra.mxu1 %v3649_v39  ;;  %2567 = vmatpush1.bf16.msra.mxu0 %v3673_v51 }
 0x316   :  { %2537 = vmatprep.subr.bf16.mxu1 %v3675_v52  ;;  %2569 = vmatprep.subr.bf16.mxu0 %v3699_v1 }
 0x319   :  { %2539 = vmatpush1.bf16.msra.mxu1 %v3697_v63  ;;  %2571 = vmatpush1.bf16.msra.mxu0 %v3703_v3 }
 0x31a   :  { %2573 = vmatprep.subr.bf16.mxu1 %v3429_v21  ;;  %2605 = vmatprep.subr.bf16.mxu0 %v3442_v26 }
 0x3cf   :  { %v842_v48 = vpop.f32.mrb[4].mxu1  ;;  %v913_v15 = vpop.f32.mrb[12].mxu0 }
 0x3d0   :  { %v2878_v16 = vadd.f32 %v842_v48, %v3719_v9  ;;  %v844_v19 = vpop.f32.mrb[5].mxu1  ;;  %v915_v20 = vpop.f32.mrb[13].mxu0  ;;  %v2892_v5 = vadd.f32 %v913_v15, %v3724_v17 }
 0x3d1   :  { %v2879_v22 = vadd.f32 %v844_v19, %v3782_v4  ;;  %v2893_v30 = vadd.f32 %v915_v20, %v3729_v32 }
 0x3d2   :  { %v2092_v27 = vmul.f32 -1.442695, %v2878_v16  ;;  %v2094_v8 = vmul.f32 -1.442695, %v2892_v5 }
 0x3d3   :  { %v2093_v28 = vmul.f32 -1.442695, %v2879_v22 }
 0x3d4   :  { %2963 = vpow2.f32 %v2092_v27 }
 0x3d5   :  { %2965 = vpow2.f32 %v2093_v28 }
 0x3d6   :  { %2967 = vtanh.f32 %v2893_v30 }
 0x3d7   :  { %2969 = vpow2.f32 %v2094_v8 }
 0x3de   :  { %v2964_v34 = vpop.eup %2963 }
 0x3df   :  { %v931_v35 = vadd.f32 1.0, %v2964_v34  ;;  %v2966_v40 = vpop.eup %2965 }
 0x3e0   :  { %v932_v42 = vadd.f32 1.0, %v2966_v40  ;;  %v2968_v43 = vpop.eup %2967 }
 0x3e1   :  { %2971 = vrcp.f32 %v931_v35  ;;  %v2970_v46 = vpop.eup %2969 }
 0x3e2   :  { %2973 = vrcp.f32 %v932_v42  ;;  %v933_v60 = vadd.f32 1.0, %v2970_v46 }
 0x3e4   :  { %2975 = vrcp.f32 %v933_v60 }
 0x3eb   :  { %v2972_v47 = vpop.eup %2971 }
 0x3ec   :  { %v942_v54 = vmul.f32 %v2972_v47, %v2968_v43  ;;  %v2974_v55 = vpop.eup %2973 }
 0x3ed   :  { %v941_v7 = vmul.f32 %v2974_v55, %v3789_v59 }
 0x3ee   :  { %v2976_v48 = vpop.eup %2975 }
 0x3ef   :  { %v3837_v13 = vadd.f32 %v942_v54, %v941_v7 }
 0x3f1   :  { %2977 = vtanh.f32 %v3837_v13 }
 0x3fb   :  { %v2978_v15 = vpop.eup %2977 }
 0x3fc   :  { %v3840_v16 = vmul.f32 %v2978_v15, %v2976_v48 }
 0x3fe   :  { %1015 = vmatmul.mubr.f32.vlgmr.msra.gmra.mrb[6].mxu1 %v3840_v16  ;;  %1086 = vmatmul.mubr.f32.vlgmr.msra.gmra.mrb[14].mxu0 %v3840_v16  ;;  %v1829_v19 = vmul.f32 %v3738_v56, %v3840_v16 }
 0x3ff   :  { %2575 = vmatpush1.bf16.msra.mxu1 %v3440_v25  ;;  %2607 = vmatpush1.bf16.msra.mxu0 %v3451_v29 }
 0x400   :  { %1830 = vadd.xlane.f32.xlu1 %v1829_v19  ;;  %2577 = vmatprep.subr.bf16.mxu1 %v3465_v33 }
 0x401   :  { %2609 = vmatprep.subr.bf16.mxu0 %v3478_v38  ;;  %1188 = vmatprep.mubr.f32.mxu1 %v3077_v0 }
 0x402   :  { %1259 = vmatprep.mubr.f32.mxu0 %v3077_v0 }
 0x403   :  { %2579 = vmatpush1.bf16.msra.mxu1 %v3476_v37  ;;  %2611 = vmatpush1.bf16.msra.mxu0 %v3487_v41 }
 0x404   :  { %2581 = vmatprep.subr.bf16.mxu1 %v3501_v45  ;;  %2613 = vmatprep.subr.bf16.mxu0 %v3514_v50 }
 0x407   :  { %2583 = vmatpush1.bf16.msra.mxu1 %v3512_v49  ;;  %2615 = vmatpush1.bf16.msra.mxu0 %v3523_v53 }
 0x408   :  { %2585 = vmatprep.subr.bf16.mxu1 %v3537_v57  ;;  %2617 = vmatprep.subr.bf16.mxu0 %v3550_v62 }
 0x40b   :  { %2587 = vmatpush1.bf16.msra.mxu1 %v3548_v61  ;;  %2619 = vmatpush1.bf16.msra.mxu0 %v3559_v2 }
 0x40c   :  { %2589 = vmatprep.subr.bf16.mxu1 %v3573_v6  ;;  %2621 = vmatprep.subr.bf16.mxu0 %v3586_v11 }
 0x40f   :  { %2591 = vmatpush1.bf16.msra.mxu1 %v3584_v10  ;;  %2623 = vmatpush1.bf16.msra.mxu0 %v3595_v14 }
 0x410   :  { %2593 = vmatprep.subr.bf16.mxu1 %v3609_v18  ;;  %2625 = vmatprep.subr.bf16.mxu0 %v3622_v24 }
 0x413   :  { %2595 = vmatpush1.bf16.msra.mxu1 %v3620_v23  ;;  %2627 = vmatpush1.bf16.msra.mxu0 %v3634_v31 }
 0x414   :  { %2597 = vmatprep.subr.bf16.mxu1 %v3647_v36  ;;  %2629 = vmatprep.subr.bf16.mxu0 %v3661_v44 }
 0x417   :  { %2599 = vmatpush1.bf16.msra.mxu1 %v3649_v39  ;;  %2631 = vmatpush1.bf16.msra.mxu0 %v3673_v51 }
 0x418   :  { %2601 = vmatprep.subr.bf16.mxu1 %v3675_v52  ;;  %2633 = vmatprep.subr.bf16.mxu0 %v3699_v1 }
 0x41b   :  { %2603 = vmatpush1.bf16.msra.mxu1 %v3697_v63  ;;  %2635 = vmatpush1.bf16.msra.mxu0 %v3703_v3 }
 0x41c   :  { %2637 = vmatprep.subr.bf16.mxu1 %v3429_v21  ;;  %2669 = vmatprep.subr.bf16.mxu0 %v3442_v26 }
 0x4d1   :  { %v1016_v59 = vpop.f32.mrb[6].mxu1  ;;  %v1087_v20 = vpop.f32.mrb[14].mxu0 }
 0x4d2   :  { %v2880_v22 = vadd.f32 %v1016_v59, %v3719_v9  ;;  %v1018_v27 = vpop.f32.mrb[7].mxu1  ;;  %v1089_v28 = vpop.f32.mrb[15].mxu0  ;;  %v2894_v34 = vadd.f32 %v1087_v20, %v3724_v17 }
 0x4d3   :  { %v2881_v5 = vadd.f32 %v1018_v27, %v3782_v4  ;;  %v2895_v35 = vadd.f32 %v1089_v28, %v3729_v32 }
 0x4d4   :  { %v2095_v30 = vmul.f32 -1.442695, %v2880_v22  ;;  %v2097_v40 = vmul.f32 -1.442695, %v2894_v34 }
 0x4d5   :  { %v2096_v8 = vmul.f32 -1.442695, %v2881_v5 }
 0x4d6   :  { %2979 = vpow2.f32 %v2095_v30 }
 0x4d7   :  { %2981 = vpow2.f32 %v2096_v8 }
 0x4d8   :  { %2983 = vtanh.f32 %v2895_v35 }
 0x4d9   :  { %2985 = vpow2.f32 %v2097_v40 }
 0x4e0   :  { %v2980_v42 = vpop.eup %2979 }
 0x4e1   :  { %v1105_v43 = vadd.f32 1.0, %v2980_v42  ;;  %v2982_v46 = vpop.eup %2981 }
 0x4e2   :  { %v1106_v47 = vadd.f32 1.0, %v2982_v46  ;;  %v2984_v54 = vpop.eup %2983 }
 0x4e3   :  { %2987 = vrcp.f32 %v1105_v43  ;;  %v2986_v55 = vpop.eup %2985 }
 0x4e4   :  { %2989 = vrcp.f32 %v1106_v47  ;;  %v1107_v15 = vadd.f32 1.0, %v2986_v55 }
 0x4e6   :  { %2991 = vrcp.f32 %v1107_v15 }
 0x4ed   :  { %v2988_v60 = vpop.eup %2987 }
 0x4ee   :  { %v1116_v7 = vmul.f32 %v2988_v60, %v2984_v54  ;;  %v2990_v48 = vpop.eup %2989 }
 0x4ef   :  { %v1115_v19 = vmul.f32 %v2990_v48, %v3837_v13 }
 0x4f0   :  { %v2992_v20 = vpop.eup %2991 }
 0x4f1   :  { %v3885_v59 = vadd.f32 %v1116_v7, %v1115_v19 }
 0x4f3   :  { %2993 = vtanh.f32 %v3885_v59 }
 0x4fd   :  { %v2994_v22 = vpop.eup %2993 }
 0x4fe   :  { %v3888_v27 = vmul.f32 %v2994_v22, %v2992_v20 }
 0x500   :  { %1189 = vmatmul.mubr.f32.vlgmr.msra.gmra.mrb[8].mxu1 %v3888_v27  ;;  %1260 = vmatmul.mubr.f32.vlgmr.msra.gmra.mrb[16].mxu0 %v3888_v27  ;;  %v1832_v28 = vmul.f32 %v3738_v56, %v3888_v27 }
 0x501   :  { %2639 = vmatpush1.bf16.msra.mxu1 %v3440_v25  ;;  %2671 = vmatpush1.bf16.msra.mxu0 %v3451_v29 }
 0x502   :  { %1833 = vadd.xlane.f32.xlu1 %v1832_v28  ;;  %2641 = vmatprep.subr.bf16.mxu1 %v3465_v33 }
 0x503   :  { %2673 = vmatprep.subr.bf16.mxu0 %v3478_v38  ;;  %1362 = vmatprep.mubr.f32.mxu1 %v3077_v0 }
 0x504   :  { %1433 = vmatprep.mubr.f32.mxu0 %v3077_v0 }
 0x505   :  { %2643 = vmatpush1.bf16.msra.mxu1 %v3476_v37  ;;  %2675 = vmatpush1.bf16.msra.mxu0 %v3487_v41 }
 0x506   :  { %2645 = vmatprep.subr.bf16.mxu1 %v3501_v45  ;;  %2677 = vmatprep.subr.bf16.mxu0 %v3514_v50 }
 0x509   :  { %2647 = vmatpush1.bf16.msra.mxu1 %v3512_v49  ;;  %2679 = vmatpush1.bf16.msra.mxu0 %v3523_v53 }
 0x50a   :  { %2649 = vmatprep.subr.bf16.mxu1 %v3537_v57  ;;  %2681 = vmatprep.subr.bf16.mxu0 %v3550_v62 }
 0x50d   :  { %2651 = vmatpush1.bf16.msra.mxu1 %v3548_v61  ;;  %2683 = vmatpush1.bf16.msra.mxu0 %v3559_v2 }
 0x50e   :  { %2653 = vmatprep.subr.bf16.mxu1 %v3573_v6  ;;  %2685 = vmatprep.subr.bf16.mxu0 %v3586_v11 }
 0x511   :  { %2655 = vmatpush1.bf16.msra.mxu1 %v3584_v10  ;;  %2687 = vmatpush1.bf16.msra.mxu0 %v3595_v14 }
 0x512   :  { %2657 = vmatprep.subr.bf16.mxu1 %v3609_v18  ;;  %2689 = vmatprep.subr.bf16.mxu0 %v3622_v24 }
 0x515   :  { %2659 = vmatpush1.bf16.msra.mxu1 %v3620_v23  ;;  %2691 = vmatpush1.bf16.msra.mxu0 %v3634_v31 }
 0x516   :  { %2661 = vmatprep.subr.bf16.mxu1 %v3647_v36  ;;  %2693 = vmatprep.subr.bf16.mxu0 %v3661_v44 }
 0x519   :  { %2663 = vmatpush1.bf16.msra.mxu1 %v3649_v39  ;;  %2695 = vmatpush1.bf16.msra.mxu0 %v3673_v51 }
 0x51a   :  { %2665 = vmatprep.subr.bf16.mxu1 %v3675_v52  ;;  %2697 = vmatprep.subr.bf16.mxu0 %v3699_v1 }
 0x51d   :  { %2667 = vmatpush1.bf16.msra.mxu1 %v3697_v63  ;;  %2699 = vmatpush1.bf16.msra.mxu0 %v3703_v3 }
 0x51e   :  { %2701 = vmatprep.subr.bf16.mxu1 %v3429_v21  ;;  %2733 = vmatprep.subr.bf16.mxu0 %v3442_v26 }
 0x5d3   :  { %v1190_v13 = vpop.f32.mrb[8].mxu1  ;;  %v1261_v5 = vpop.f32.mrb[16].mxu0 }
 0x5d4   :  { %v2882_v30 = vadd.f32 %v1190_v13, %v3719_v9  ;;  %v1192_v8 = vpop.f32.mrb[9].mxu1  ;;  %v1263_v34 = vpop.f32.mrb[17].mxu0  ;;  %v2896_v43 = vadd.f32 %v1261_v5, %v3724_v17 }
 0x5d5   :  { %v2883_v35 = vadd.f32 %v1192_v8, %v3782_v4  ;;  %v2897_v46 = vadd.f32 %v1263_v34, %v3729_v32 }
 0x5d6   :  { %v2098_v40 = vmul.f32 -1.442695, %v2882_v30  ;;  %v2100_v47 = vmul.f32 -1.442695, %v2896_v43 }
 0x5d7   :  { %v2099_v42 = vmul.f32 -1.442695, %v2883_v35 }
 0x5d8   :  { %2995 = vpow2.f32 %v2098_v40 }
 0x5d9   :  { %2997 = vpow2.f32 %v2099_v42 }
 0x5da   :  { %2999 = vtanh.f32 %v2897_v46 }
 0x5db   :  { %3001 = vpow2.f32 %v2100_v47 }
 0x5e2   :  { %v2996_v54 = vpop.eup %2995 }
 0x5e3   :  { %v1279_v55 = vadd.f32 1.0, %v2996_v54  ;;  %v2998_v60 = vpop.eup %2997 }
 0x5e4   :  { %v1280_v7 = vadd.f32 1.0, %v2998_v60  ;;  %v3000_v48 = vpop.eup %2999 }
 0x5e5   :  { %3003 = vrcp.f32 %v1279_v55  ;;  %v3002_v15 = vpop.eup %3001 }
 0x5e6   :  { %3005 = vrcp.f32 %v1280_v7  ;;  %v1281_v28 = vadd.f32 1.0, %v3002_v15 }
 0x5e8   :  { %3007 = vrcp.f32 %v1281_v28 }
 0x5ef   :  { %v3004_v19 = vpop.eup %3003 }
 0x5f0   :  { %v1290_v20 = vmul.f32 %v3004_v19, %v3000_v48  ;;  %v3006_v22 = vpop.eup %3005 }
 0x5f1   :  { %v1289_v13 = vmul.f32 %v3006_v22, %v3885_v59 }
 0x5f2   :  { %v3008_v30 = vpop.eup %3007 }
 0x5f3   :  { %v3933_v5 = vadd.f32 %v1290_v20, %v1289_v13 }
 0x5f5   :  { %3009 = vtanh.f32 %v3933_v5 }
 0x5ff   :  { %v3010_v8 = vpop.eup %3009 }
 0x600   :  { %v3936_v34 = vmul.f32 %v3010_v8, %v3008_v30 }
 0x602   :  { %1363 = vmatmul.mubr.f32.vlgmr.msra.gmra.mrb[10].mxu1 %v3936_v34  ;;  %1434 = vmatmul.mubr.f32.vlgmr.msra.gmra.mrb[18].mxu0 %v3936_v34  ;;  %v1835_v35 = vmul.f32 %v3738_v56, %v3936_v34 }
 0x603   :  { %2703 = vmatpush1.bf16.msra.mxu1 %v3440_v25  ;;  %2735 = vmatpush1.bf16.msra.mxu0 %v3451_v29 }
 0x604   :  { %1836 = vadd.xlane.f32.xlu0 %v1835_v35  ;;  %2705 = vmatprep.subr.bf16.mxu1 %v3465_v33 }
 0x605   :  { %2737 = vmatprep.subr.bf16.mxu0 %v3478_v38  ;;  %1536 = vmatprep.mubr.f32.mxu1 %v3077_v0 }
 0x606   :  { %1607 = vmatprep.mubr.f32.mxu0 %v3077_v0 }
 0x607   :  { %2707 = vmatpush1.bf16.msra.mxu1 %v3476_v37  ;;  %2739 = vmatpush1.bf16.msra.mxu0 %v3487_v41 }
 0x608   :  { %2709 = vmatprep.subr.bf16.mxu1 %v3501_v45  ;;  %2741 = vmatprep.subr.bf16.mxu0 %v3514_v50 }
 0x60b   :  { %2711 = vmatpush1.bf16.msra.mxu1 %v3512_v49  ;;  %2743 = vmatpush1.bf16.msra.mxu0 %v3523_v53 }
 0x60c   :  { %2713 = vmatprep.subr.bf16.mxu1 %v3537_v57  ;;  %2745 = vmatprep.subr.bf16.mxu0 %v3550_v62 }
 0x60f   :  { %2715 = vmatpush1.bf16.msra.mxu1 %v3548_v61  ;;  %2747 = vmatpush1.bf16.msra.mxu0 %v3559_v2 }
 0x610   :  { %2717 = vmatprep.subr.bf16.mxu1 %v3573_v6  ;;  %2749 = vmatprep.subr.bf16.mxu0 %v3586_v11 }
 0x613   :  { %2719 = vmatpush1.bf16.msra.mxu1 %v3584_v10  ;;  %2751 = vmatpush1.bf16.msra.mxu0 %v3595_v14 }
 0x614   :  { %2721 = vmatprep.subr.bf16.mxu1 %v3609_v18  ;;  %2753 = vmatprep.subr.bf16.mxu0 %v3622_v24 }
 0x617   :  { %2723 = vmatpush1.bf16.msra.mxu1 %v3620_v23  ;;  %2755 = vmatpush1.bf16.msra.mxu0 %v3634_v31 }
 0x618   :  { %2725 = vmatprep.subr.bf16.mxu1 %v3647_v36  ;;  %2757 = vmatprep.subr.bf16.mxu0 %v3661_v44 }
 0x61b   :  { %2727 = vmatpush1.bf16.msra.mxu1 %v3649_v39  ;;  %2759 = vmatpush1.bf16.msra.mxu0 %v3673_v51 }
 0x61c   :  { %2729 = vmatprep.subr.bf16.mxu1 %v3675_v52  ;;  %2761 = vmatprep.subr.bf16.mxu0 %v3699_v1 }
 0x61f   :  { %2731 = vmatpush1.bf16.msra.mxu1 %v3697_v63  ;;  %2763 = vmatpush1.bf16.msra.mxu0 %v3703_v3 }
 0x620   :  { %2765 = vmatprep.subr.bf16.mxu1 %v3429_v21  ;;  %2797 = vmatprep.subr.bf16.mxu0 %v3442_v26 }
 0x6d5   :  { %v1364_v59 = vpop.f32.mrb[10].mxu1  ;;  %v1435_v40 = vpop.f32.mrb[18].mxu0 }
 0x6d6   :  { %v2884_v42 = vadd.f32 %v1364_v59, %v3719_v9  ;;  %v1366_v43 = vpop.f32.mrb[11].mxu1  ;;  %v1437_v46 = vpop.f32.mrb[19].mxu0  ;;  %v2898_v60 = vadd.f32 %v1435_v40, %v3724_v17 }
 0x6d7   :  { %v2885_v47 = vadd.f32 %v1366_v43, %v3782_v4  ;;  %v2899_v7 = vadd.f32 %v1437_v46, %v3729_v32 }
 0x6d8   :  { %v2101_v54 = vmul.f32 -1.442695, %v2884_v42  ;;  %v2103_v48 = vmul.f32 -1.442695, %v2898_v60 }
 0x6d9   :  { %v2102_v55 = vmul.f32 -1.442695, %v2885_v47 }
 0x6da   :  { %3011 = vpow2.f32 %v2101_v54 }
 0x6db   :  { %3013 = vpow2.f32 %v2102_v55 }
 0x6dc   :  { %3015 = vtanh.f32 %v2899_v7 }
 0x6dd   :  { %3017 = vpow2.f32 %v2103_v48 }
 0x6e4   :  { %v3012_v21 = vpop.eup %3011 }
 0x6e5   :  { %v1453_v15 = vadd.f32 1.0, %v3012_v21  ;;  %v3014_v26 = vpop.eup %3013 }
 0x6e6   :  { %v1454_v19 = vadd.f32 1.0, %v3014_v26  ;;  %v3016_v20 = vpop.eup %3015 }
 0x6e7   :  { %3019 = vrcp.f32 %v1453_v15  ;;  %v3018_v22 = vpop.eup %3017 }
 0x6e8   :  { %3021 = vrcp.f32 %v1454_v19  ;;  %v1455_v8 = vadd.f32 1.0, %v3018_v22 }
 0x6ea   :  { %3023 = vrcp.f32 %v1455_v8 }
 0x6f1   :  { %v3020_v28 = vpop.eup %3019 }
 0x6f2   :  { %v1464_v13 = vmul.f32 %v3020_v28, %v3016_v20  ;;  %v3022_v30 = vpop.eup %3021 }
 0x6f3   :  { %v1463_v35 = vmul.f32 %v3022_v30, %v3933_v5 }
 0x6f4   :  { %v3024_v40 = vpop.eup %3023 }
 0x6f5   :  { %v3981_v59 = vadd.f32 %v1464_v13, %v1463_v35 }
 0x6f7   :  { %3025 = vtanh.f32 %v3981_v59 }
 0x701   :  { %v3026_v42 = vpop.eup %3025 }
 0x702   :  { %v3984_v43 = vmul.f32 %v3026_v42, %v3024_v40  ;;  %v1902_v42 = vld [vmem:[%s4176_s7] sm:$0xff] }
 0x704   :  { %1537 = vmatmul.mubr.f32.vlgmr.msra.gmra.mrb[12].mxu1 %v3984_v43  ;;  %1608 = vmatmul.mubr.f32.vlgmr.msra.gmra.mrb[20].mxu0 %v3984_v43  ;;  %v1838_v46 = vmul.f32 %v3738_v56, %v3984_v43 }
 0x705   :  { %2767 = vmatpush1.bf16.msra.mxu1 %v3440_v25  ;;  %2799 = vmatpush1.bf16.msra.mxu0 %v3451_v29 }
 0x706   :  { %1839 = vadd.xlane.f32.xlu1 %v1838_v46  ;;  %2769 = vmatprep.subr.bf16.mxu1 %v3465_v33  ;;  %v1903_v46 = vld [vmem:[%s4176_s7 + $0x8] sm:$0xff] }
 0x707   :  { %2801 = vmatprep.subr.bf16.mxu0 %v3478_v38  ;;  %1710 = vmatprep.mubr.f32.mxu1 %v3077_v0 }
 0x708   :  { %1781 = vmatprep.mubr.f32.mxu0 %v3077_v0 }
 0x709   :  { %2771 = vmatpush1.bf16.msra.mxu1 %v3476_v37  ;;  %2803 = vmatpush1.bf16.msra.mxu0 %v3487_v41 }
 0x70a   :  { %2773 = vmatprep.subr.bf16.mxu1 %v3501_v45  ;;  %2805 = vmatprep.subr.bf16.mxu0 %v3514_v50 }
 0x70d   :  { %2775 = vmatpush1.bf16.msra.mxu1 %v3512_v49  ;;  %2807 = vmatpush1.bf16.msra.mxu0 %v3523_v53 }
 0x70e   :  { %2777 = vmatprep.subr.bf16.mxu1 %v3537_v57  ;;  %2809 = vmatprep.subr.bf16.mxu0 %v3550_v62 }
 0x711   :  { %2779 = vmatpush1.bf16.msra.mxu1 %v3548_v61  ;;  %2811 = vmatpush1.bf16.msra.mxu0 %v3559_v2 }
 0x712   :  { %2781 = vmatprep.subr.bf16.mxu1 %v3573_v6  ;;  %2813 = vmatprep.subr.bf16.mxu0 %v3586_v11 }
 0x715   :  { %2783 = vmatpush1.bf16.msra.mxu1 %v3584_v10  ;;  %2815 = vmatpush1.bf16.msra.mxu0 %v3595_v14 }
 0x716   :  { %2785 = vmatprep.subr.bf16.mxu1 %v3609_v18  ;;  %2817 = vmatprep.subr.bf16.mxu0 %v3622_v24 }
 0x719   :  { %2787 = vmatpush1.bf16.msra.mxu1 %v3620_v23  ;;  %2819 = vmatpush1.bf16.msra.mxu0 %v3634_v31 }
 0x71a   :  { %2789 = vmatprep.subr.bf16.mxu1 %v3647_v36  ;;  %2821 = vmatprep.subr.bf16.mxu0 %v3661_v44 }
 0x71d   :  { %2791 = vmatpush1.bf16.msra.mxu1 %v3649_v39  ;;  %2823 = vmatpush1.bf16.msra.mxu0 %v3673_v51 }
 0x71e   :  { %2793 = vmatprep.subr.bf16.mxu1 %v3675_v52  ;;  %2825 = vmatprep.subr.bf16.mxu0 %v3699_v1 }
 0x721   :  { %2795 = vmatpush1.bf16.msra.mxu1 %v3697_v63  ;;  %2827 = vmatpush1.bf16.msra.mxu0 %v3703_v3 }
 0x7d7   :  { %v1538_v25 = vpop.f32.mrb[12].mxu1  ;;  %v1609_v29 = vpop.f32.mrb[20].mxu0 }
 0x7d8   :  { %v2886_v33 = vadd.f32 %v1538_v25, %v3719_v9  ;;  %v1540_v37 = vpop.f32.mrb[13].mxu1  ;;  %v1611_v38 = vpop.f32.mrb[21].mxu0  ;;  %v2900_v50 = vadd.f32 %v1609_v29, %v3724_v17  ;;  %v2829_v25 = vpack.c.bf16 %v1903_v46, %v1902_v42  ;;  %v3078_v29 = vmov 0.0|0.0  }
 0x7d9   :  { %v2887_v41 = vadd.f32 %v1540_v37, %v3782_v4  ;;  %v2901_v53 = vadd.f32 %v1611_v38, %v3729_v32  ;;  %2828 = vmatprep.subr.bf16.mxu1 %v3078_v29  ;;  %2852 = vmatprep.subr.bf16.mxu0 %v3078_v29  ;;  %v1906_v38 = vld [vmem:[%s4176_s7 + $0x20] sm:$0xff] }
 0x7da   :  { %v2104_v45 = vmul.f32 -1.442695, %v2886_v33  ;;  %v2106_v57 = vmul.f32 -1.442695, %v2900_v50  ;;  %v1905_v33 = vld [vmem:[%s4176_s7 + $0x18] sm:$0xff] }
 0x7db   :  { %v2105_v49 = vmul.f32 -1.442695, %v2887_v41  ;;  %v1907_v41 = vld [vmem:[%s4176_s7 + $0x28] sm:$0xff]  ;;  %v1909_v50 = vld [vmem:[%s4176_s7 + $0x38] sm:$0xff] }
 0x7dc   :  { %3027 = vpow2.f32 %v2104_v45  ;;  %v2835_v45 = vpack.c.bf16 %v1907_v41, %v1906_v38 }
 0x7dd   :  { %3029 = vpow2.f32 %v2105_v49  ;;  %v1908_v49 = vld [vmem:[%s4176_s7 + $0x30] sm:$0xff] }
 0x7de   :  { %3031 = vtanh.f32 %v2901_v53  ;;  %v2838_v53 = vpack.c.bf16 %v1909_v50, %v1908_v49 }
 0x7df   :  { %3033 = vpow2.f32 %v2106_v57  ;;  %v1910_v57 = vld [vmem:[%s4176_s7 + $0x40] sm:$0xff] }
 0x7e6   :  { %v3028_v61 = vpop.eup %3027 }
 0x7e7   :  { %v1627_v62 = vadd.f32 1.0, %v3028_v61  ;;  %v3030_v2 = vpop.eup %3029  ;;  %v1911_v61 = vld [vmem:[%s4176_s7 + $0x48] sm:$0xff] }
 0x7e8   :  { %v1628_v6 = vadd.f32 1.0, %v3030_v2  ;;  %v3032_v10 = vpop.eup %3031  ;;  %v1912_v2 = vld [vmem:[%s4176_s7 + $0x50] sm:$0xff] }
 0x7e9   :  { %3035 = vrcp.f32 %v1627_v62  ;;  %v3034_v11 = vpop.eup %3033  ;;  %v2841_v62 = vpack.c.bf16 %v1911_v61, %v1910_v57 }
 0x7ea   :  { %3037 = vrcp.f32 %v1628_v6  ;;  %v1629_v24 = vadd.f32 1.0, %v3034_v11  ;;  %v1913_v6 = vld [vmem:[%s4176_s7 + $0x58] sm:$0xff]  ;;  %v1914_v11 = vld [vmem:[%s4176_s7 + $0x60] sm:$0xff] }
 0x7ec   :  { %3039 = vrcp.f32 %v1629_v24 }
 0x7f3   :  { %v3036_v14 = vpop.eup %3035 }
 0x7f4   :  { %v1638_v18 = vmul.f32 %v3036_v14, %v3032_v10  ;;  %v3038_v23 = vpop.eup %3037  ;;  %v2844_v10 = vpack.c.bf16 %v1913_v6, %v1912_v2  ;;  %v1915_v14 = vld [vmem:[%s4176_s7 + $0x68] sm:$0xff] }
 0x7f5   :  { %v1637_v31 = vmul.f32 %v3038_v23, %v3981_v59  ;;  %v1917_v23 = vld [vmem:[%s4176_s7 + $0x78] sm:$0xff] }
 0x7f6   :  { %v3040_v39 = vpop.eup %3039 }
 0x7f7   :  { %v1639_v36 = vadd.f32 %v1638_v18, %v1637_v31  ;;  %v2847_v18 = vpack.c.bf16 %v1915_v14, %v1914_v11  ;;  %v1988_v31 = vld [vmem:[%s4177_s8] sm:$0xff] }
 0x7f9   :  { %3041 = vtanh.f32 %v1639_v36 }
 0x803   :  { %v3042_v44 = vpop.eup %3041 }
 0x804   :  { %v4027_v51 = vmul.f32 %v3042_v44, %v3040_v39  ;;  %v1990_v39 = vld [vmem:[%s4177_s8 + $0x10] sm:$0xff] }
 0x806   :  { %1711 = vmatmul.mubr.f32.vlgmr.msra.gmra.mrb[14].mxu1 %v4027_v51  ;;  %1782 = vmatmul.mubr.f32.vlgmr.msra.gmra.mrb[22].mxu0 %v4027_v51  ;;  %v1841_v52 = vmul.f32 %v3738_v56, %v4027_v51 }
 0x807   :  { %2830 = vmatpush3.bf16.msra.mxu1 %v2829_v25  ;;  %2246 = vmatprep.mubr.msk.f32.mxu1 %vm3079_vm0, %v3077_v0 }
 0x808   :  { %1842 = vadd.xlane.f32.xlu0 %v1841_v52  ;;  %2831 = vmatprep.subr.bf16.mxu1 %v3078_v29  ;;  %v1991_v52 = vld [vmem:[%s4177_s8 + $0x18] sm:$0xff] }
 0x809   :  { %2281 = vmatprep.mubr.msk.f32.mxu0 %vm3079_vm0, %v3077_v0  ;;  %v1916_v0 = vld [vmem:[%s4176_s7 + $0x70] sm:$0xff] }
 0x80a   :  { %v2850_v24 = vpack.c.bf16 %v1917_v23, %v1916_v0 }
 0x8d9   :  { %v1712_v63 = vpop.f32.mrb[14].mxu1  ;;  %v1783_v1 = vpop.f32.mrb[22].mxu0 }
 0x8da   :  { %v2888_v3 = vadd.f32 %v1712_v63, %v3719_v9  ;;  %v1714_v5 = vpop.f32.mrb[15].mxu1  ;;  %v1785_v47 = vpop.f32.mrb[23].mxu0  ;;  %v2902_v7 = vadd.f32 %v1783_v1, %v3724_v17  ;;  %v2856_v63 = vpack.c.bf16 %v1991_v52, %v1990_v39  ;;  %v1992_v1 = vld [vmem:[%s4177_s8 + $0x20] sm:$0xff] }
 0x8db   :  { %v2889_v54 = vadd.f32 %v1714_v5, %v3782_v4  ;;  %v2903_v48 = vadd.f32 %v1785_v47, %v3729_v32  ;;  %v1994_v47 = vld [vmem:[%s4177_s8 + $0x30] sm:$0xff] }
 0x8dc   :  { %v2107_v55 = vmul.f32 -1.442695, %v2888_v3  ;;  %v2109_v21 = vmul.f32 -1.442695, %v2902_v7  ;;  %v1993_v3 = vld [vmem:[%s4177_s8 + $0x28] sm:$0xff] }
 0x8dd   :  { %v2108_v60 = vmul.f32 -1.442695, %v2889_v54  ;;  %v2859_v5 = vpack.c.bf16 %v1993_v3, %v1992_v1  ;;  %v1995_v54 = vld [vmem:[%s4177_s8 + $0x38] sm:$0xff]  ;;  %v1997_v7 = vld [vmem:[%s4177_s8 + $0x48] sm:$0xff] }
 0x8de   :  { %3043 = vpow2.f32 %v2107_v55  ;;  %v2862_v55 = vpack.c.bf16 %v1995_v54, %v1994_v47 }
 0x8df   :  { %3045 = vpow2.f32 %v2108_v60  ;;  %v1996_v60 = vld [vmem:[%s4177_s8 + $0x40] sm:$0xff] }
 0x8e0   :  { %3047 = vtanh.f32 %v2903_v48  ;;  %v2865_v48 = vpack.c.bf16 %v1997_v7, %v1996_v60 }
 0x8e1   :  { %3049 = vpow2.f32 %v2109_v21  ;;  %v1998_v21 = vld [vmem:[%s4177_s8 + $0x50] sm:$0xff] }
 0x8e8   :  { %v3044_v15 = vpop.eup %3043 }
 0x8e9   :  { %v1801_v26 = vadd.f32 1.0, %v3044_v15  ;;  %v3046_v19 = vpop.eup %3045  ;;  %v1999_v15 = vld [vmem:[%s4177_s8 + $0x58] sm:$0xff] }
 0x8ea   :  { %v1802_v9 = vadd.f32 1.0, %v3046_v19  ;;  %v3048_v20 = vpop.eup %3047  ;;  %v2000_v19 = vld [vmem:[%s4177_s8 + $0x60] sm:$0xff] }
 0x8eb   :  { %3051 = vrcp.f32 %v1801_v26  ;;  %v3050_v22 = vpop.eup %3049  ;;  %v2868_v26 = vpack.c.bf16 %v1999_v15, %v1998_v21 }
 0x8ec   :  { %3053 = vrcp.f32 %v1802_v9  ;;  %v1803_v30 = vadd.f32 1.0, %v3050_v22  ;;  %v2001_v9 = vld [vmem:[%s4177_s8 + $0x68] sm:$0xff]  ;;  %v2002_v22 = vld [vmem:[%s4177_s8 + $0x70] sm:$0xff] }
 0x8ee   :  { %3055 = vrcp.f32 %v1803_v30 }
 0x8f5   :  { %v3052_v4 = vpop.eup %3051 }
 0x8f6   :  { %v1812_v28 = vmul.f32 %v3052_v4, %v3048_v20  ;;  %v3054_v13 = vpop.eup %3053  ;;  %v2871_v20 = vpack.c.bf16 %v2001_v9, %v2000_v19  ;;  %v2003_v4 = vld [vmem:[%s4177_s8 + $0x78] sm:$0xff] }
 0x8f7   :  { %v1811_v8 = vmul.f32 %v3054_v13, %v1639_v36  ;;  %v1989_v36 = vld [vmem:[%s4177_s8 + $0x8] sm:$0xff]  ;;  %v1825_v13 = vpop.xlane.xlu0 %1824 }
 0x8f8   :  { %v3056_v17 = vpop.eup %3055  ;;  %v2853_v44 = vpack.c.bf16 %v1989_v36, %v1988_v31 }
 0x8f9   :  { %v1813_v35 = vadd.f32 %v1812_v28, %v1811_v8  ;;  %v2874_v28 = vpack.c.bf16 %v2003_v4, %v2002_v22  ;;  %v1831_v8 = vpop.xlane.xlu1 %1830 }
 0x8fa   :  { %2854 = vmatpush3.bf16.msra.mxu0 %v2853_v44 }
 0x8fb   :  { %3057 = vtanh.f32 %v1813_v35  ;;  %2855 = vmatprep.subr.bf16.mxu0 %v3078_v29  ;;  %v1828_v30 = vpop.xlane.xlu0 %1827 }
 0x8fc   :  { %v1847_v35 = vmax.f32 %v1825_v13, %v1828_v30 }
 0x8fe   :  { %2857 = vmatpush3.bf16.msra.mxu0 %v2856_v63 }
 0x8ff   :  { %2858 = vmatprep.subr.bf16.mxu0 %v3078_v29 }
 0x902   :  { %2860 = vmatpush3.bf16.msra.mxu0 %v2859_v5 }
 0x903   :  { %2861 = vmatprep.subr.bf16.mxu0 %v3078_v29 }
 0x905   :  { %v3058_v32 = vpop.eup %3057 }
 0x906   :  { %v4037_v59 = vmul.f32 %v3058_v32, %v3056_v17  ;;  %2863 = vmatpush3.bf16.msra.mxu0 %v2862_v55  ;;  %v1834_v17 = vpop.xlane.xlu1 %1833  ;;  %v1848_v32 = vmax.f32 %v1847_v35, %v1831_v8 }
 0x907   :  { %2864 = vmatprep.subr.bf16.mxu0 %v3078_v29 }
 0x908   :  { %v1844_v40 = vmul.f32 %v3738_v56, %v4037_v59  ;;  %v1904_v56 = vld [vmem:[%s4176_s7 + $0x10] sm:$0xff]  ;;  %v1849_v42 = vmax.f32 %v1848_v32, %v1834_v17 }
 0x909   :  { %v2832_v37 = vpack.c.bf16 %v1905_v33, %v1904_v56 }
 0x90a   :  { %1845 = vadd.xlane.f32.xlu1 %v1844_v40  ;;  %2866 = vmatpush3.bf16.msra.mxu0 %v2865_v48  ;;  %v1837_v40 = vpop.xlane.xlu0 %1836  ;;  %v1840_v46 = vpop.xlane.xlu1 %1839 }
 0x90b   :  { %2833 = vmatpush3.bf16.msra.mxu1 %v2832_v37  ;;  %2867 = vmatprep.subr.bf16.mxu0 %v3078_v29  ;;  %v1850_v25 = vmax.f32 %v1849_v42, %v1837_v40 }
 0x90c   :  { %2834 = vmatprep.subr.bf16.mxu1 %v3078_v29 }
 0x90d   :  { %v1851_v33 = vmax.f32 %v1850_v25, %v1840_v46 }
 0x90e   :  { %2869 = vmatpush3.bf16.msra.mxu0 %v2868_v26  ;;  %v1843_v56 = vpop.xlane.xlu0 %1842 }
 0x90f   :  { %2836 = vmatpush3.bf16.msra.mxu1 %v2835_v45  ;;  %2870 = vmatprep.subr.bf16.mxu0 %v3078_v29  ;;  %v1852_v37 = vmax.f32 %v1851_v33, %v1843_v56 }
 0x910   :  { %2837 = vmatprep.subr.bf16.mxu1 %v3078_v29 }
 0x912   :  { %2872 = vmatpush3.bf16.msra.mxu0 %v2871_v20 }
 0x913   :  { %2839 = vmatpush3.bf16.msra.mxu1 %v2838_v53  ;;  %2873 = vmatprep.subr.bf16.mxu0 %v3078_v29 }
 0x914   :  { %2840 = vmatprep.subr.bf16.mxu1 %v3078_v29 }
 0x916   :  { %2875 = vmatpush3.bf16.msra.mxu0 %v2874_v28 }
 0x917   :  { %2842 = vmatpush3.bf16.msra.mxu1 %v2841_v62 }
 0x918   :  { %2843 = vmatprep.subr.bf16.mxu1 %v3078_v29 }
 0x91b   :  { %2845 = vmatpush3.bf16.msra.mxu1 %v2844_v10 }
 0x91c   :  { %2846 = vmatprep.subr.bf16.mxu1 %v3078_v29 }
 0x91f   :  { %2848 = vmatpush3.bf16.msra.mxu1 %v2847_v18 }
 0x920   :  { %2849 = vmatprep.subr.bf16.mxu1 %v3078_v29 }
 0x923   :  { %2851 = vmatpush3.bf16.msra.mxu1 %v2850_v24 }
 0x997   :  { %v1846_v38 = vpop.xlane.xlu1 %1845 }
 0x998   :  { %v1853_v41 = vmax.f32 %v1852_v37, %v1846_v38 }
 0x99a   :  { %v1854_v45 = vsub.f32 %v1825_v13, %v1853_v41  ;;  %v1857_v49 = vsub.f32 %v1828_v30, %v1853_v41  ;;  %v1860_v50 = vsub.f32 %v1831_v8, %v1853_v41  ;;  %v1863_v29 = vsub.f32 %v1834_v17, %v1853_v41 }
 0x99b   :  { %v1866_v62 = vsub.f32 %v1837_v40, %v1853_v41  ;;  %v1869_v6 = vsub.f32 %v1840_v46, %v1853_v41  ;;  %v1872_v11 = vsub.f32 %v1843_v56, %v1853_v41  ;;  %v1875_v18 = vsub.f32 %v1846_v38, %v1853_v41 }
 0x99c   :  { %v1855_v53 = vmul.f32 1.442695, %v1854_v45  ;;  %v1858_v57 = vmul.f32 1.442695, %v1857_v49  ;;  %v1861_v61 = vmul.f32 1.442695, %v1860_v50 }
 0x99d   :  { %v1864_v2 = vmul.f32 1.442695, %v1863_v29  ;;  %v1867_v10 = vmul.f32 1.442695, %v1866_v62  ;;  %v1870_v14 = vmul.f32 1.442695, %v1869_v6 }
 0x99e   :  { %3059 = vpow2.f32 %v1855_v53  ;;  %v1873_v0 = vmul.f32 1.442695, %v1872_v11  ;;  %v1876_v23 = vmul.f32 1.442695, %v1875_v18 }
 0x99f   :  { %3061 = vpow2.f32 %v1858_v57 }
 0x9a0   :  { %3063 = vpow2.f32 %v1861_v61 }
 0x9a1   :  { %3065 = vpow2.f32 %v1864_v2 }
 0x9a2   :  { %3067 = vpow2.f32 %v1867_v10 }
 0x9a3   :  { %3069 = vpow2.f32 %v1870_v14 }
 0x9a4   :  { %3071 = vpow2.f32 %v1873_v0 }
 0x9a5   :  { %3073 = vpow2.f32 %v1876_v23 }
 0x9a8   :  { %v3060_v24 = vpop.eup %3059 }
 0x9a9   :  { %v3062_v31 = vpop.eup %3061  ;;  %v1886_v36 = vmul.f32 %v3060_v24, %v3740_v58 }
 0x9aa   :  { %v3064_v39 = vpop.eup %3063  ;;  %v1878_v44 = vadd.f32 %v3062_v31, %v3060_v24  ;;  %v1887_v52 = vmul.f32 %v3062_v31, %v3792_v12 }
 0x9ab   :  { %v3066_v63 = vpop.eup %3065  ;;  %v1889_v5 = vmul.f32 %v3064_v39, %v3840_v16 }
 0x9ac   :  { %v1879_v1 = vadd.f32 %v3064_v39, %v1878_v44  ;;  %v1888_v3 = vadd.f32 %v1887_v52, %v1886_v36  ;;  %v3068_v55 = vpop.eup %3067  ;;  %v1891_v60 = vmul.f32 %v3066_v63, %v3888_v27 }
 0x9ad   :  { %v3070_v48 = vpop.eup %3069  ;;  %v1893_v26 = vmul.f32 %v3068_v55, %v3936_v34  ;;  %v2111_v34 = vld [vmem:[%s4178_s9] ss:$0 sm:$0xff] }
 0x9ae   :  { %v1880_v47 = vadd.f32 %v3066_v63, %v1879_v1  ;;  %v1890_v54 = vadd.f32 %v1889_v5, %v1888_v3  ;;  %v3072_v58 = vpop.eup %3071  ;;  %v1895_v22 = vmul.f32 %v3070_v48, %v3984_v43 }
 0x9af   :  { %v3074_v12 = vpop.eup %3073  ;;  %v1897_v4 = vmul.f32 %v3072_v58, %v4027_v51 }
 0x9b0   :  { %v1881_v7 = vadd.f32 %v3068_v55, %v1880_v47  ;;  %v1892_v21 = vadd.f32 %v1891_v60, %v1890_v54  ;;  %v1899_v27 = vmul.f32 %v3074_v12, %v4037_v59 }
 0x9b2   :  { %v1882_v15 = vadd.f32 %v3070_v48, %v1881_v7  ;;  %v1894_v9 = vadd.f32 %v1893_v26, %v1892_v21 }
 0x9b4   :  { %v1883_v19 = vadd.f32 %v3072_v58, %v1882_v15  ;;  %v1896_v16 = vadd.f32 %v1895_v22, %v1894_v9 }
 0x9b6   :  { %v1884_v20 = vadd.f32 %v3074_v12, %v1883_v19  ;;  %v1898_v28 = vadd.f32 %v1897_v4, %v1896_v16 }
 0x9b8   :  { %3075 = vrcp.f32 %v1884_v20  ;;  %v1900_v13 = vadd.f32 %v1899_v27, %v1898_v28 }
 0x9c2   :  { %v3076_v30 = vpop.eup %3075 }
 0x9c3   :  { %v1901_v8 = vmul.f32 %v3076_v30, %v1900_v13 }
 0x9c5   :  { %2247 = vmatmul.mubr.f32.vlgmr.msra.gmra.mrb[16].mxu1 %v1901_v8 }
 0xa98   :  { %v1984_v35 = vpop.f32.mrb[16].mxu1 }
 0xa99   :  { %v2248_v17 = vpop.f32.mrb[17].mxu1  ;;  %2282 = vmatmul.mubr.f32.vlgmr.msra.gmra.mrb[24].mxu0 %v1984_v35 }
 0xb6c   :  { %v2077_v32 = vpop.f32.mrb[24].mxu0 }
 0xb6d   :  { %v2078_v43 = vadd.f32 %v2111_v34, %v2077_v32  ;;  %v2283_v40 = vpop.f32.mrb[25].mxu0 }
 0xb6f   :  { %2081 = vst [vmem:[%s4179_s10] sm:$0xff] %v2078_v43 }

</bundles_post_ra>
